<compile_context>
chip_gen: v6e
topology: v6e:2x2x1
jax: 0.10.0
libtpu: 0.0.40
codegen_flags: <defaults>
</compile_context>

<pallas_src>
import jax
import jax.numpy as jnp
from jax.experimental import pallas as pl
from jax.experimental.pallas import tpu as pltpu


def _round_up(x, m):
    return (x + m - 1) // m * m


def _make_gru_kernel(seq_len, bp, hp):
    """Build the GRU kernel for static (seq_len, padded batch bp, padded hidden hp)."""

    def kernel(x_ref, wih_ref, whh_ref, bih_ref, bhh_ref, out_ref, gi_scr):
        # ---- Hoisted, non-recurrent input projection: one big MXU call. ----
        # x_ref:   (S*Bp, In)
        # wih_ref: (In, 3*Hp)   gates packed r|z|n, each 128-lane aligned
        # gi_scr:  (S*Bp, 3*Hp) f32 scratch holding gi for all timesteps
        gi_scr[...] = (
            jnp.dot(x_ref[...], wih_ref[...], preferred_element_type=jnp.float32)
            + bih_ref[...]
        )

        whh = whh_ref[...]          # (Hp, 3*Hp)
        bhh = bhh_ref[...]          # (1, 3*Hp) f32

        def step(t, h):
            row = pl.multiple_of(t * bp, bp)          # sublane-aligned offset
            gi = gi_scr[pl.ds(row, bp), :]            # (Bp, 3*Hp)
            gh = (
                jnp.dot(h.astype(whh.dtype), whh,
                        preferred_element_type=jnp.float32)
                + bhh
            )
            r = jax.nn.sigmoid(gi[:, 0:hp] + gh[:, 0:hp])
            z = jax.nn.sigmoid(gi[:, hp:2 * hp] + gh[:, hp:2 * hp])
            n = jnp.tanh(gi[:, 2 * hp:3 * hp] + r * gh[:, 2 * hp:3 * hp])
            h_new = (1.0 - z) * n + z * h
            out_ref[pl.ds(row, bp), :] = h_new.astype(out_ref.dtype)
            return h_new

        h0 = jnp.zeros((bp, hp), jnp.float32)         # zero initial hidden
        jax.lax.fori_loop(0, seq_len, step, h0, unroll=True)

    return kernel


def pack_gru_params(w_ih, w_hh, b_ih, b_hh):
    """Pack PyTorch-layout GRU params ((3H,In),(3H,H),(3H,),(3H,)) into
    transposed, 128-lane-padded form: (In,3Hp), (Hp,3Hp), (1,3Hp), (1,3Hp)."""
    H = w_hh.shape[1]
    In = w_ih.shape[1]
    Hp = _round_up(H, 128)
    w_ih_t = jnp.zeros((In, 3 * Hp), jnp.float32)
    w_hh_t = jnp.zeros((Hp, 3 * Hp), jnp.float32)
    b_ih_p = jnp.zeros((1, 3 * Hp), jnp.float32)
    b_hh_p = jnp.zeros((1, 3 * Hp), jnp.float32)
    for g in range(3):                  # gate order r, z, n (PyTorch packing)
        src = slice(g * H, (g + 1) * H)
        dst = slice(g * Hp, g * Hp + H)
        w_ih_t = w_ih_t.at[:, dst].set(w_ih[src, :].T)
        w_hh_t = w_hh_t.at[:H, dst].set(w_hh[src, :].T)
        b_ih_p = b_ih_p.at[0, dst].set(b_ih[src])
        b_hh_p = b_hh_p.at[0, dst].set(b_hh[src])
    # Zero-padded weights/biases keep the padded hidden columns exactly 0
    # through the recurrence, so padding never leaks into real outputs.
    return w_ih_t, w_hh_t, b_ih_p, b_hh_p, H, Hp


def gru_encoder_forward(input_, hidden_unused, params, *, weight_dtype=jnp.float32):
    """Pallas implementation of Encoder.forward(input_, hidden).

    input_: (S, B, In) float32.  `hidden_unused` is ignored (as in the PyTorch
    forward).  `params` are PyTorch-layout GRU weights.
    Returns (output (S, B, H), hidden (1, B, H)).

    weight_dtype=jnp.bfloat16 is recommended on v6e/v7x (MXU is bf16-native);
    accumulation and the hidden carry stay float32 either way.
    """
    del hidden_unused
    w_ih, w_hh, b_ih, b_hh = params
    S, B, In = input_.shape
    w_ih_t, w_hh_t, b_ih_p, b_hh_p, H, Hp = pack_gru_params(w_ih, w_hh, b_ih, b_hh)
    Bp = _round_up(B, 8)

    # Pad batch to full sublanes; padded rows are sliced away afterwards.
    x = jnp.zeros((S, Bp, In), jnp.float32).at[:, :B, :].set(
        input_.astype(jnp.float32))
    x2d = x.reshape(S * Bp, In)

    w_ih_t = w_ih_t.astype(weight_dtype)
    w_hh_t = w_hh_t.astype(weight_dtype)
    if weight_dtype != jnp.float32:
        x2d = x2d.astype(weight_dtype)

    kernel = _make_gru_kernel(S, Bp, Hp)
    # Single grid step; the whole problem lives in VMEM (a few hundred KB at
    # these sizes), so there is nothing to pipeline.
    # Note: for very large batch on v7x, add a "parallel" batch grid axis so
    # both TensorCores run half the recurrence each.
    out2d = pl.pallas_call(
        kernel,
        out_shape=jax.ShapeDtypeStruct((S * Bp, Hp), jnp.float32),
        grid_spec=pltpu.PrefetchScalarGridSpec(
            num_scalar_prefetch=0,
            grid=(1,),
            in_specs=[
                pl.BlockSpec((S * Bp, In), lambda i: (0, 0)),     # x (all steps)
                pl.BlockSpec((In, 3 * Hp), lambda i: (0, 0)),     # W_ih^T packed
                pl.BlockSpec((Hp, 3 * Hp), lambda i: (0, 0)),     # W_hh^T packed
                pl.BlockSpec((1, 3 * Hp), lambda i: (0, 0)),      # b_ih packed
                pl.BlockSpec((1, 3 * Hp), lambda i: (0, 0)),      # b_hh packed
            ],
            out_specs=pl.BlockSpec((S * Bp, Hp), lambda i: (0, 0)),
            scratch_shapes=[pltpu.VMEM((S * Bp, 3 * Hp), jnp.float32)],
        ),
        compiler_params=pltpu.CompilerParams(
            dimension_semantics=("arbitrary",),
        ),
    )(x2d, w_ih_t, w_hh_t, b_ih_p, b_hh_p)

    out = out2d.reshape(S, Bp, Hp)[:, :B, :H]
    hidden = out[S - 1:S]      # final hidden == last output (zero initial state)
    return out, hidden


def init_gru_params(key, input_dim, hidden_dim):
    """Deterministic PyTorch-style init: U(-1/sqrt(H), 1/sqrt(H)), PyTorch layout."""
    k = 1.0 / jnp.sqrt(jnp.float32(hidden_dim))
    k1, k2, k3, k4 = jax.random.split(key, 4)
    w_ih = jax.random.uniform(k1, (3 * hidden_dim, input_dim), jnp.float32, -k, k)
    w_hh = jax.random.uniform(k2, (3 * hidden_dim, hidden_dim), jnp.float32, -k, k)
    b_ih = jax.random.uniform(k3, (3 * hidden_dim,), jnp.float32, -k, k)
    b_hh = jax.random.uniform(k4, (3 * hidden_dim,), jnp.float32, -k, k)
    return (w_ih, w_hh, b_ih, b_hh)


def _gru_reference(input_, params):
    """Pure-JAX reference of torch.nn.GRU (zero initial hidden), for sanity check."""
    w_ih, w_hh, b_ih, b_hh = params
    H = w_hh.shape[1]
    B = input_.shape[1]

    def step(h, x):
        gi = x @ w_ih.T + b_ih
        gh = h @ w_hh.T + b_hh
        r = jax.nn.sigmoid(gi[:, :H] + gh[:, :H])
        z = jax.nn.sigmoid(gi[:, H:2 * H] + gh[:, H:2 * H])
        n = jnp.tanh(gi[:, 2 * H:] + r * gh[:, 2 * H:])
        h_new = (1.0 - z) * n + z * h
        return h_new, h_new

    h0 = jnp.zeros((B, H), jnp.float32)
    h_last, outs = jax.lax.scan(step, h0, input_)
    return outs, h_last[None]


if __name__ == "__main__":
    seq_len, batch, input_dim, hidden_dim = 8, 4, 16, 32

    key = jax.random.PRNGKey(0)
    k_x, k_h, k_p = jax.random.split(key, 3)
    x = jax.random.normal(k_x, (seq_len, batch, input_dim), jnp.float32)
    # `hidden` argument exists in the PyTorch signature but is ignored by forward().
    hidden_arg = jax.random.normal(k_h, (1, batch, hidden_dim), jnp.float32)
    params = init_gru_params(k_p, input_dim, hidden_dim)

    out, h_n = gru_encoder_forward(x, hidden_arg, params)
    out = jax.block_until_ready(out)
    h_n = jax.block_until_ready(h_n)

    # Sanity check against pure-JAX GRU reference.
    ref_out, ref_h = _gru_reference(x, params)
    assert out.shape == (seq_len, batch, hidden_dim)
    assert h_n.shape == (1, batch, hidden_dim)
    assert jnp.allclose(out, ref_out, atol=1e-5), "output mismatch"
    assert jnp.allclose(h_n, ref_h, atol=1e-5), "hidden mismatch"

    print("KERNEL_OK")
</pallas_src>

<mosaic_0001>
module attributes {stable_mosaic.version = 11 : i64} {
  func.func @kernel(%arg0: i32, %arg1: memref<64x16xf32, #tpu.memory_space<vmem>>, %arg2: memref<16x384xf32, #tpu.memory_space<vmem>>, %arg3: memref<128x384xf32, #tpu.memory_space<vmem>>, %arg4: memref<1x384xf32, #tpu.memory_space<vmem>>, %arg5: memref<1x384xf32, #tpu.memory_space<vmem>>, %arg6: memref<64x128xf32, #tpu.memory_space<vmem>>, %arg7: memref<64x384xf32, #tpu.memory_space<vmem>>) attributes {dimension_semantics = [#tpu.dimension_semantics<arbitrary>], iteration_bounds = array<i64: 1>, scalar_prefetch = 0 : i64, scratch_operands = 1 : i64, tpu.core_type = #tpu.core_type<tc>, window_params = [{pipeline_mode = #tpu.pipeline_mode<synchronous>, transform_indices = @transform_0, window_bounds = array<i64: 64, 16>}, {pipeline_mode = #tpu.pipeline_mode<synchronous>, transform_indices = @transform_1, window_bounds = array<i64: 16, 384>}, {pipeline_mode = #tpu.pipeline_mode<synchronous>, transform_indices = @transform_2, window_bounds = array<i64: 128, 384>}, {pipeline_mode = #tpu.pipeline_mode<synchronous>, transform_indices = @transform_3, window_bounds = array<i64: 1, 384>}, {pipeline_mode = #tpu.pipeline_mode<synchronous>, transform_indices = @transform_4, window_bounds = array<i64: 1, 384>}, {pipeline_mode = #tpu.pipeline_mode<synchronous>, transform_indices = @transform_5, window_bounds = array<i64: 64, 128>}]} {
    %c0 = arith.constant 0 : index
    %c0_0 = arith.constant 0 : index
    %0 = vector.load %arg1[%c0, %c0_0] : memref<64x16xf32, #tpu.memory_space<vmem>>, vector<64x16xf32>
    %c0_1 = arith.constant 0 : index
    %c0_2 = arith.constant 0 : index
    %1 = vector.load %arg2[%c0_1, %c0_2] : memref<16x384xf32, #tpu.memory_space<vmem>>, vector<16x384xf32>
    %cst = arith.constant dense<0.000000e+00> : vector<64x384xf32>
    %2 = tpu.matmul %0, %1, %cst {dimension_numbers = #tpu.dot_dimension_numbers<[1], [0], [0], [1], [0, 0, 1, 1], [], []>} : vector<64x16xf32>, vector<16x384xf32>, vector<64x384xf32> -> vector<64x384xf32>
    %c0_3 = arith.constant 0 : index
    %c0_4 = arith.constant 0 : index
    %3 = vector.load %arg4[%c0_3, %c0_4] : memref<1x384xf32, #tpu.memory_space<vmem>>, vector<1x384xf32>
    %4 = vector.broadcast %3 : vector<1x384xf32> to vector<64x384xf32>
    %5 = arith.addf %2, %4 : vector<64x384xf32>
    %c0_5 = arith.constant 0 : index
    %c0_6 = arith.constant 0 : index
    %6 = vector.load %arg7[%c0_5, %c0_6] : memref<64x384xf32, #tpu.memory_space<vmem>>, vector<64x384xf32>
    tpu.vector_store %arg7[%c0_5, %c0_6], %5 {strides = array<i32>} : memref<64x384xf32, #tpu.memory_space<vmem>>, vector<64x384xf32>,
    %c0_7 = arith.constant 0 : index
    %c0_8 = arith.constant 0 : index
    %7 = vector.load %arg3[%c0_7, %c0_8] : memref<128x384xf32, #tpu.memory_space<vmem>>, vector<128x384xf32>
    %c0_9 = arith.constant 0 : index
    %c0_10 = arith.constant 0 : index
    %8 = vector.load %arg5[%c0_9, %c0_10] : memref<1x384xf32, #tpu.memory_space<vmem>>, vector<1x384xf32>
    %cst_11 = arith.constant 0.000000e+00 : f32
    %9 = vector.broadcast %cst_11 : f32 to vector<8x128xf32>
    %c0_i32 = arith.constant 0 : i32
    %c8_i32 = arith.constant 8 : i32
    %10 = arith.muli %c0_i32, %c8_i32 : i32
    %11 = tpu.assume_multiple %10, 8 : i32
    %12 = arith.index_cast %11 : i32 to index
    %c0_12 = arith.constant 0 : index
    %13 = vector.load %arg7[%12, %c0_12] : memref<64x384xf32, #tpu.memory_space<vmem>>, vector<8x384xf32>
    %cst_13 = arith.constant dense<0.000000e+00> : vector<8x384xf32>
    %14 = tpu.matmul %9, %7, %cst_13 {dimension_numbers = #tpu.dot_dimension_numbers<[1], [0], [0], [1], [0, 0, 1, 1], [], []>} : vector<8x128xf32>, vector<128x384xf32>, vector<8x384xf32> -> vector<8x384xf32>
    %15 = vector.broadcast %8 : vector<1x384xf32> to vector<8x384xf32>
    %16 = arith.addf %14, %15 : vector<8x384xf32>
    %17 = vector.extract_strided_slice %13 {offsets = [0, 0], sizes = [8, 128], strides = [1, 1]} : vector<8x384xf32> to vector<8x128xf32>
    %18 = vector.extract_strided_slice %16 {offsets = [0, 0], sizes = [8, 128], strides = [1, 1]} : vector<8x384xf32> to vector<8x128xf32>
    %19 = arith.addf %17, %18 : vector<8x128xf32>
    %20 = arith.negf %19 : vector<8x128xf32>
    %21 = math.exp %20 : vector<8x128xf32>
    %cst_14 = arith.constant 1.000000e+00 : f32
    %22 = vector.broadcast %cst_14 : f32 to vector<8x128xf32>
    %23 = arith.addf %22, %21 : vector<8x128xf32>
    %24 = arith.divf %22, %23 : vector<8x128xf32>
    %25 = vector.extract_strided_slice %13 {offsets = [0, 128], sizes = [8, 128], strides = [1, 1]} : vector<8x384xf32> to vector<8x128xf32>
    %26 = vector.extract_strided_slice %16 {offsets = [0, 128], sizes = [8, 128], strides = [1, 1]} : vector<8x384xf32> to vector<8x128xf32>
    %27 = arith.addf %25, %26 : vector<8x128xf32>
    %28 = arith.negf %27 : vector<8x128xf32>
    %29 = math.exp %28 : vector<8x128xf32>
    %cst_15 = arith.constant 1.000000e+00 : f32
    %30 = vector.broadcast %cst_15 : f32 to vector<8x128xf32>
    %31 = arith.addf %30, %29 : vector<8x128xf32>
    %32 = arith.divf %30, %31 : vector<8x128xf32>
    %33 = vector.extract_strided_slice %13 {offsets = [0, 256], sizes = [8, 128], strides = [1, 1]} : vector<8x384xf32> to vector<8x128xf32>
    %34 = vector.extract_strided_slice %16 {offsets = [0, 256], sizes = [8, 128], strides = [1, 1]} : vector<8x384xf32> to vector<8x128xf32>
    %35 = arith.mulf %24, %34 : vector<8x128xf32>
    %36 = arith.addf %33, %35 : vector<8x128xf32>
    %37 = math.tanh %36 : vector<8x128xf32>
    %cst_16 = arith.constant 1.000000e+00 : f32
    %38 = vector.broadcast %cst_16 : f32 to vector<8x128xf32>
    %39 = arith.subf %38, %32 : vector<8x128xf32>
    %40 = arith.mulf %39, %37 : vector<8x128xf32>
    %41 = arith.mulf %32, %9 : vector<8x128xf32>
    %42 = arith.addf %40, %41 : vector<8x128xf32>
    %43 = arith.index_cast %11 : i32 to index
    %c0_17 = arith.constant 0 : index
    %44 = vector.load %arg6[%43, %c0_17] : memref<64x128xf32, #tpu.memory_space<vmem>>, vector<8x128xf32>
    tpu.vector_store %arg6[%43, %c0_17], %42 {strides = array<i32>} : memref<64x128xf32, #tpu.memory_space<vmem>>, vector<8x128xf32>,
    %c1_i32 = arith.constant 1 : i32
    %c8_i32_18 = arith.constant 8 : i32
    %45 = arith.muli %c1_i32, %c8_i32_18 : i32
    %46 = tpu.assume_multiple %45, 8 : i32
    %47 = arith.index_cast %46 : i32 to index
    %c0_19 = arith.constant 0 : index
    %48 = vector.load %arg7[%47, %c0_19] : memref<64x384xf32, #tpu.memory_space<vmem>>, vector<8x384xf32>
    %cst_20 = arith.constant dense<0.000000e+00> : vector<8x384xf32>
    %49 = tpu.matmul %42, %7, %cst_20 {dimension_numbers = #tpu.dot_dimension_numbers<[1], [0], [0], [1], [0, 0, 1, 1], [], []>} : vector<8x128xf32>, vector<128x384xf32>, vector<8x384xf32> -> vector<8x384xf32>
    %50 = vector.broadcast %8 : vector<1x384xf32> to vector<8x384xf32>
    %51 = arith.addf %49, %50 : vector<8x384xf32>
    %52 = vector.extract_strided_slice %48 {offsets = [0, 0], sizes = [8, 128], strides = [1, 1]} : vector<8x384xf32> to vector<8x128xf32>
    %53 = vector.extract_strided_slice %51 {offsets = [0, 0], sizes = [8, 128], strides = [1, 1]} : vector<8x384xf32> to vector<8x128xf32>
    %54 = arith.addf %52, %53 : vector<8x128xf32>
    %55 = arith.negf %54 : vector<8x128xf32>
    %56 = math.exp %55 : vector<8x128xf32>
    %cst_21 = arith.constant 1.000000e+00 : f32
    %57 = vector.broadcast %cst_21 : f32 to vector<8x128xf32>
    %58 = arith.addf %57, %56 : vector<8x128xf32>
    %59 = arith.divf %57, %58 : vector<8x128xf32>
    %60 = vector.extract_strided_slice %48 {offsets = [0, 128], sizes = [8, 128], strides = [1, 1]} : vector<8x384xf32> to vector<8x128xf32>
    %61 = vector.extract_strided_slice %51 {offsets = [0, 128], sizes = [8, 128], strides = [1, 1]} : vector<8x384xf32> to vector<8x128xf32>
    %62 = arith.addf %60, %61 : vector<8x128xf32>
    %63 = arith.negf %62 : vector<8x128xf32>
    %64 = math.exp %63 : vector<8x128xf32>
    %cst_22 = arith.constant 1.000000e+00 : f32
    %65 = vector.broadcast %cst_22 : f32 to vector<8x128xf32>
    %66 = arith.addf %65, %64 : vector<8x128xf32>
    %67 = arith.divf %65, %66 : vector<8x128xf32>
    %68 = vector.extract_strided_slice %48 {offsets = [0, 256], sizes = [8, 128], strides = [1, 1]} : vector<8x384xf32> to vector<8x128xf32>
    %69 = vector.extract_strided_slice %51 {offsets = [0, 256], sizes = [8, 128], strides = [1, 1]} : vector<8x384xf32> to vector<8x128xf32>
    %70 = arith.mulf %59, %69 : vector<8x128xf32>
    %71 = arith.addf %68, %70 : vector<8x128xf32>
    %72 = math.tanh %71 : vector<8x128xf32>
    %cst_23 = arith.constant 1.000000e+00 : f32
    %73 = vector.broadcast %cst_23 : f32 to vector<8x128xf32>
    %74 = arith.subf %73, %67 : vector<8x128xf32>
    %75 = arith.mulf %74, %72 : vector<8x128xf32>
    %76 = arith.mulf %67, %42 : vector<8x128xf32>
    %77 = arith.addf %75, %76 : vector<8x128xf32>
    %78 = arith.index_cast %46 : i32 to index
    %c0_24 = arith.constant 0 : index
    %79 = vector.load %arg6[%78, %c0_24] : memref<64x128xf32, #tpu.memory_space<vmem>>, vector<8x128xf32>
    tpu.vector_store %arg6[%78, %c0_24], %77 {strides = array<i32>} : memref<64x128xf32, #tpu.memory_space<vmem>>, vector<8x128xf32>,
    %c2_i32 = arith.constant 2 : i32
    %c8_i32_25 = arith.constant 8 : i32
    %80 = arith.muli %c2_i32, %c8_i32_25 : i32
    %81 = tpu.assume_multiple %80, 8 : i32
    %82 = arith.index_cast %81 : i32 to index
    %c0_26 = arith.constant 0 : index
    %83 = vector.load %arg7[%82, %c0_26] : memref<64x384xf32, #tpu.memory_space<vmem>>, vector<8x384xf32>
    %cst_27 = arith.constant dense<0.000000e+00> : vector<8x384xf32>
    %84 = tpu.matmul %77, %7, %cst_27 {dimension_numbers = #tpu.dot_dimension_numbers<[1], [0], [0], [1], [0, 0, 1, 1], [], []>} : vector<8x128xf32>, vector<128x384xf32>, vector<8x384xf32> -> vector<8x384xf32>
    %85 = vector.broadcast %8 : vector<1x384xf32> to vector<8x384xf32>
    %86 = arith.addf %84, %85 : vector<8x384xf32>
    %87 = vector.extract_strided_slice %83 {offsets = [0, 0], sizes = [8, 128], strides = [1, 1]} : vector<8x384xf32> to vector<8x128xf32>
    %88 = vector.extract_strided_slice %86 {offsets = [0, 0], sizes = [8, 128], strides = [1, 1]} : vector<8x384xf32> to vector<8x128xf32>
    %89 = arith.addf %87, %88 : vector<8x128xf32>
    %90 = arith.negf %89 : vector<8x128xf32>
    %91 = math.exp %90 : vector<8x128xf32>
    %cst_28 = arith.constant 1.000000e+00 : f32
    %92 = vector.broadcast %cst_28 : f32 to vector<8x128xf32>
    %93 = arith.addf %92, %91 : vector<8x128xf32>
    %94 = arith.divf %92, %93 : vector<8x128xf32>
    %95 = vector.extract_strided_slice %83 {offsets = [0, 128], sizes = [8, 128], strides = [1, 1]} : vector<8x384xf32> to vector<8x128xf32>
    %96 = vector.extract_strided_slice %86 {offsets = [0, 128], sizes = [8, 128], strides = [1, 1]} : vector<8x384xf32> to vector<8x128xf32>
    %97 = arith.addf %95, %96 : vector<8x128xf32>
    %98 = arith.negf %97 : vector<8x128xf32>
    %99 = math.exp %98 : vector<8x128xf32>
    %cst_29 = arith.constant 1.000000e+00 : f32
    %100 = vector.broadcast %cst_29 : f32 to vector<8x128xf32>
    %101 = arith.addf %100, %99 : vector<8x128xf32>
    %102 = arith.divf %100, %101 : vector<8x128xf32>
    %103 = vector.extract_strided_slice %83 {offsets = [0, 256], sizes = [8, 128], strides = [1, 1]} : vector<8x384xf32> to vector<8x128xf32>
    %104 = vector.extract_strided_slice %86 {offsets = [0, 256], sizes = [8, 128], strides = [1, 1]} : vector<8x384xf32> to vector<8x128xf32>
    %105 = arith.mulf %94, %104 : vector<8x128xf32>
    %106 = arith.addf %103, %105 : vector<8x128xf32>
    %107 = math.tanh %106 : vector<8x128xf32>
    %cst_30 = arith.constant 1.000000e+00 : f32
    %108 = vector.broadcast %cst_30 : f32 to vector<8x128xf32>
    %109 = arith.subf %108, %102 : vector<8x128xf32>
    %110 = arith.mulf %109, %107 : vector<8x128xf32>
    %111 = arith.mulf %102, %77 : vector<8x128xf32>
    %112 = arith.addf %110, %111 : vector<8x128xf32>
    %113 = arith.index_cast %81 : i32 to index
    %c0_31 = arith.constant 0 : index
    %114 = vector.load %arg6[%113, %c0_31] : memref<64x128xf32, #tpu.memory_space<vmem>>, vector<8x128xf32>
    tpu.vector_store %arg6[%113, %c0_31], %112 {strides = array<i32>} : memref<64x128xf32, #tpu.memory_space<vmem>>, vector<8x128xf32>,
    %c3_i32 = arith.constant 3 : i32
    %c8_i32_32 = arith.constant 8 : i32
    %115 = arith.muli %c3_i32, %c8_i32_32 : i32
    %116 = tpu.assume_multiple %115, 8 : i32
    %117 = arith.index_cast %116 : i32 to index
    %c0_33 = arith.constant 0 : index
    %118 = vector.load %arg7[%117, %c0_33] : memref<64x384xf32, #tpu.memory_space<vmem>>, vector<8x384xf32>
    %cst_34 = arith.constant dense<0.000000e+00> : vector<8x384xf32>
    %119 = tpu.matmul %112, %7, %cst_34 {dimension_numbers = #tpu.dot_dimension_numbers<[1], [0], [0], [1], [0, 0, 1, 1], [], []>} : vector<8x128xf32>, vector<128x384xf32>, vector<8x384xf32> -> vector<8x384xf32>
    %120 = vector.broadcast %8 : vector<1x384xf32> to vector<8x384xf32>
    %121 = arith.addf %119, %120 : vector<8x384xf32>
    %122 = vector.extract_strided_slice %118 {offsets = [0, 0], sizes = [8, 128], strides = [1, 1]} : vector<8x384xf32> to vector<8x128xf32>
    %123 = vector.extract_strided_slice %121 {offsets = [0, 0], sizes = [8, 128], strides = [1, 1]} : vector<8x384xf32> to vector<8x128xf32>
    %124 = arith.addf %122, %123 : vector<8x128xf32>
    %125 = arith.negf %124 : vector<8x128xf32>
    %126 = math.exp %125 : vector<8x128xf32>
    %cst_35 = arith.constant 1.000000e+00 : f32
    %127 = vector.broadcast %cst_35 : f32 to vector<8x128xf32>
    %128 = arith.addf %127, %126 : vector<8x128xf32>
    %129 = arith.divf %127, %128 : vector<8x128xf32>
    %130 = vector.extract_strided_slice %118 {offsets = [0, 128], sizes = [8, 128], strides = [1, 1]} : vector<8x384xf32> to vector<8x128xf32>
    %131 = vector.extract_strided_slice %121 {offsets = [0, 128], sizes = [8, 128], strides = [1, 1]} : vector<8x384xf32> to vector<8x128xf32>
    %132 = arith.addf %130, %131 : vector<8x128xf32>
    %133 = arith.negf %132 : vector<8x128xf32>
    %134 = math.exp %133 : vector<8x128xf32>
    %cst_36 = arith.constant 1.000000e+00 : f32
    %135 = vector.broadcast %cst_36 : f32 to vector<8x128xf32>
    %136 = arith.addf %135, %134 : vector<8x128xf32>
    %137 = arith.divf %135, %136 : vector<8x128xf32>
    %138 = vector.extract_strided_slice %118 {offsets = [0, 256], sizes = [8, 128], strides = [1, 1]} : vector<8x384xf32> to vector<8x128xf32>
    %139 = vector.extract_strided_slice %121 {offsets = [0, 256], sizes = [8, 128], strides = [1, 1]} : vector<8x384xf32> to vector<8x128xf32>
    %140 = arith.mulf %129, %139 : vector<8x128xf32>
    %141 = arith.addf %138, %140 : vector<8x128xf32>
    %142 = math.tanh %141 : vector<8x128xf32>
    %cst_37 = arith.constant 1.000000e+00 : f32
    %143 = vector.broadcast %cst_37 : f32 to vector<8x128xf32>
    %144 = arith.subf %143, %137 : vector<8x128xf32>
    %145 = arith.mulf %144, %142 : vector<8x128xf32>
    %146 = arith.mulf %137, %112 : vector<8x128xf32>
    %147 = arith.addf %145, %146 : vector<8x128xf32>
    %148 = arith.index_cast %116 : i32 to index
    %c0_38 = arith.constant 0 : index
    %149 = vector.load %arg6[%148, %c0_38] : memref<64x128xf32, #tpu.memory_space<vmem>>, vector<8x128xf32>
    tpu.vector_store %arg6[%148, %c0_38], %147 {strides = array<i32>} : memref<64x128xf32, #tpu.memory_space<vmem>>, vector<8x128xf32>,
    %c4_i32 = arith.constant 4 : i32
    %c8_i32_39 = arith.constant 8 : i32
    %150 = arith.muli %c4_i32, %c8_i32_39 : i32
    %151 = tpu.assume_multiple %150, 8 : i32
    %152 = arith.index_cast %151 : i32 to index
    %c0_40 = arith.constant 0 : index
    %153 = vector.load %arg7[%152, %c0_40] : memref<64x384xf32, #tpu.memory_space<vmem>>, vector<8x384xf32>
    %cst_41 = arith.constant dense<0.000000e+00> : vector<8x384xf32>
    %154 = tpu.matmul %147, %7, %cst_41 {dimension_numbers = #tpu.dot_dimension_numbers<[1], [0], [0], [1], [0, 0, 1, 1], [], []>} : vector<8x128xf32>, vector<128x384xf32>, vector<8x384xf32> -> vector<8x384xf32>
    %155 = vector.broadcast %8 : vector<1x384xf32> to vector<8x384xf32>
    %156 = arith.addf %154, %155 : vector<8x384xf32>
    %157 = vector.extract_strided_slice %153 {offsets = [0, 0], sizes = [8, 128], strides = [1, 1]} : vector<8x384xf32> to vector<8x128xf32>
    %158 = vector.extract_strided_slice %156 {offsets = [0, 0], sizes = [8, 128], strides = [1, 1]} : vector<8x384xf32> to vector<8x128xf32>
    %159 = arith.addf %157, %158 : vector<8x128xf32>
    %160 = arith.negf %159 : vector<8x128xf32>
    %161 = math.exp %160 : vector<8x128xf32>
    %cst_42 = arith.constant 1.000000e+00 : f32
    %162 = vector.broadcast %cst_42 : f32 to vector<8x128xf32>
    %163 = arith.addf %162, %161 : vector<8x128xf32>
    %164 = arith.divf %162, %163 : vector<8x128xf32>
    %165 = vector.extract_strided_slice %153 {offsets = [0, 128], sizes = [8, 128], strides = [1, 1]} : vector<8x384xf32> to vector<8x128xf32>
    %166 = vector.extract_strided_slice %156 {offsets = [0, 128], sizes = [8, 128], strides = [1, 1]} : vector<8x384xf32> to vector<8x128xf32>
    %167 = arith.addf %165, %166 : vector<8x128xf32>
    %168 = arith.negf %167 : vector<8x128xf32>
    %169 = math.exp %168 : vector<8x128xf32>
    %cst_43 = arith.constant 1.000000e+00 : f32
    %170 = vector.broadcast %cst_43 : f32 to vector<8x128xf32>
    %171 = arith.addf %170, %169 : vector<8x128xf32>
    %172 = arith.divf %170, %171 : vector<8x128xf32>
    %173 = vector.extract_strided_slice %153 {offsets = [0, 256], sizes = [8, 128], strides = [1, 1]} : vector<8x384xf32> to vector<8x128xf32>
    %174 = vector.extract_strided_slice %156 {offsets = [0, 256], sizes = [8, 128], strides = [1, 1]} : vector<8x384xf32> to vector<8x128xf32>
    %175 = arith.mulf %164, %174 : vector<8x128xf32>
    %176 = arith.addf %173, %175 : vector<8x128xf32>
    %177 = math.tanh %176 : vector<8x128xf32>
    %cst_44 = arith.constant 1.000000e+00 : f32
    %178 = vector.broadcast %cst_44 : f32 to vector<8x128xf32>
    %179 = arith.subf %178, %172 : vector<8x128xf32>
    %180 = arith.mulf %179, %177 : vector<8x128xf32>
    %181 = arith.mulf %172, %147 : vector<8x128xf32>
    %182 = arith.addf %180, %181 : vector<8x128xf32>
    %183 = arith.index_cast %151 : i32 to index
    %c0_45 = arith.constant 0 : index
    %184 = vector.load %arg6[%183, %c0_45] : memref<64x128xf32, #tpu.memory_space<vmem>>, vector<8x128xf32>
    tpu.vector_store %arg6[%183, %c0_45], %182 {strides = array<i32>} : memref<64x128xf32, #tpu.memory_space<vmem>>, vector<8x128xf32>,
    %c5_i32 = arith.constant 5 : i32
    %c8_i32_46 = arith.constant 8 : i32
    %185 = arith.muli %c5_i32, %c8_i32_46 : i32
    %186 = tpu.assume_multiple %185, 8 : i32
    %187 = arith.index_cast %186 : i32 to index
    %c0_47 = arith.constant 0 : index
    %188 = vector.load %arg7[%187, %c0_47] : memref<64x384xf32, #tpu.memory_space<vmem>>, vector<8x384xf32>
    %cst_48 = arith.constant dense<0.000000e+00> : vector<8x384xf32>
    %189 = tpu.matmul %182, %7, %cst_48 {dimension_numbers = #tpu.dot_dimension_numbers<[1], [0], [0], [1], [0, 0, 1, 1], [], []>} : vector<8x128xf32>, vector<128x384xf32>, vector<8x384xf32> -> vector<8x384xf32>
    %190 = vector.broadcast %8 : vector<1x384xf32> to vector<8x384xf32>
    %191 = arith.addf %189, %190 : vector<8x384xf32>
    %192 = vector.extract_strided_slice %188 {offsets = [0, 0], sizes = [8, 128], strides = [1, 1]} : vector<8x384xf32> to vector<8x128xf32>
    %193 = vector.extract_strided_slice %191 {offsets = [0, 0], sizes = [8, 128], strides = [1, 1]} : vector<8x384xf32> to vector<8x128xf32>
    %194 = arith.addf %192, %193 : vector<8x128xf32>
    %195 = arith.negf %194 : vector<8x128xf32>
    %196 = math.exp %195 : vector<8x128xf32>
    %cst_49 = arith.constant 1.000000e+00 : f32
    %197 = vector.broadcast %cst_49 : f32 to vector<8x128xf32>
    %198 = arith.addf %197, %196 : vector<8x128xf32>
    %199 = arith.divf %197, %198 : vector<8x128xf32>
    %200 = vector.extract_strided_slice %188 {offsets = [0, 128], sizes = [8, 128], strides = [1, 1]} : vector<8x384xf32> to vector<8x128xf32>
    %201 = vector.extract_strided_slice %191 {offsets = [0, 128], sizes = [8, 128], strides = [1, 1]} : vector<8x384xf32> to vector<8x128xf32>
    %202 = arith.addf %200, %201 : vector<8x128xf32>
    %203 = arith.negf %202 : vector<8x128xf32>
    %204 = math.exp %203 : vector<8x128xf32>
    %cst_50 = arith.constant 1.000000e+00 : f32
    %205 = vector.broadcast %cst_50 : f32 to vector<8x128xf32>
    %206 = arith.addf %205, %204 : vector<8x128xf32>
    %207 = arith.divf %205, %206 : vector<8x128xf32>
    %208 = vector.extract_strided_slice %188 {offsets = [0, 256], sizes = [8, 128], strides = [1, 1]} : vector<8x384xf32> to vector<8x128xf32>
    %209 = vector.extract_strided_slice %191 {offsets = [0, 256], sizes = [8, 128], strides = [1, 1]} : vector<8x384xf32> to vector<8x128xf32>
    %210 = arith.mulf %199, %209 : vector<8x128xf32>
    %211 = arith.addf %208, %210 : vector<8x128xf32>
    %212 = math.tanh %211 : vector<8x128xf32>
    %cst_51 = arith.constant 1.000000e+00 : f32
    %213 = vector.broadcast %cst_51 : f32 to vector<8x128xf32>
    %214 = arith.subf %213, %207 : vector<8x128xf32>
    %215 = arith.mulf %214, %212 : vector<8x128xf32>
    %216 = arith.mulf %207, %182 : vector<8x128xf32>
    %217 = arith.addf %215, %216 : vector<8x128xf32>
    %218 = arith.index_cast %186 : i32 to index
    %c0_52 = arith.constant 0 : index
    %219 = vector.load %arg6[%218, %c0_52] : memref<64x128xf32, #tpu.memory_space<vmem>>, vector<8x128xf32>
    tpu.vector_store %arg6[%218, %c0_52], %217 {strides = array<i32>} : memref<64x128xf32, #tpu.memory_space<vmem>>, vector<8x128xf32>,
    %c6_i32 = arith.constant 6 : i32
    %c8_i32_53 = arith.constant 8 : i32
    %220 = arith.muli %c6_i32, %c8_i32_53 : i32
    %221 = tpu.assume_multiple %220, 8 : i32
    %222 = arith.index_cast %221 : i32 to index
    %c0_54 = arith.constant 0 : index
    %223 = vector.load %arg7[%222, %c0_54] : memref<64x384xf32, #tpu.memory_space<vmem>>, vector<8x384xf32>
    %cst_55 = arith.constant dense<0.000000e+00> : vector<8x384xf32>
    %224 = tpu.matmul %217, %7, %cst_55 {dimension_numbers = #tpu.dot_dimension_numbers<[1], [0], [0], [1], [0, 0, 1, 1], [], []>} : vector<8x128xf32>, vector<128x384xf32>, vector<8x384xf32> -> vector<8x384xf32>
    %225 = vector.broadcast %8 : vector<1x384xf32> to vector<8x384xf32>
    %226 = arith.addf %224, %225 : vector<8x384xf32>
    %227 = vector.extract_strided_slice %223 {offsets = [0, 0], sizes = [8, 128], strides = [1, 1]} : vector<8x384xf32> to vector<8x128xf32>
    %228 = vector.extract_strided_slice %226 {offsets = [0, 0], sizes = [8, 128], strides = [1, 1]} : vector<8x384xf32> to vector<8x128xf32>
    %229 = arith.addf %227, %228 : vector<8x128xf32>
    %230 = arith.negf %229 : vector<8x128xf32>
    %231 = math.exp %230 : vector<8x128xf32>
    %cst_56 = arith.constant 1.000000e+00 : f32
    %232 = vector.broadcast %cst_56 : f32 to vector<8x128xf32>
    %233 = arith.addf %232, %231 : vector<8x128xf32>
    %234 = arith.divf %232, %233 : vector<8x128xf32>
    %235 = vector.extract_strided_slice %223 {offsets = [0, 128], sizes = [8, 128], strides = [1, 1]} : vector<8x384xf32> to vector<8x128xf32>
    %236 = vector.extract_strided_slice %226 {offsets = [0, 128], sizes = [8, 128], strides = [1, 1]} : vector<8x384xf32> to vector<8x128xf32>
    %237 = arith.addf %235, %236 : vector<8x128xf32>
    %238 = arith.negf %237 : vector<8x128xf32>
    %239 = math.exp %238 : vector<8x128xf32>
    %cst_57 = arith.constant 1.000000e+00 : f32
    %240 = vector.broadcast %cst_57 : f32 to vector<8x128xf32>
    %241 = arith.addf %240, %239 : vector<8x128xf32>
    %242 = arith.divf %240, %241 : vector<8x128xf32>
    %243 = vector.extract_strided_slice %223 {offsets = [0, 256], sizes = [8, 128], strides = [1, 1]} : vector<8x384xf32> to vector<8x128xf32>
    %244 = vector.extract_strided_slice %226 {offsets = [0, 256], sizes = [8, 128], strides = [1, 1]} : vector<8x384xf32> to vector<8x128xf32>
    %245 = arith.mulf %234, %244 : vector<8x128xf32>
    %246 = arith.addf %243, %245 : vector<8x128xf32>
    %247 = math.tanh %246 : vector<8x128xf32>
    %cst_58 = arith.constant 1.000000e+00 : f32
    %248 = vector.broadcast %cst_58 : f32 to vector<8x128xf32>
    %249 = arith.subf %248, %242 : vector<8x128xf32>
    %250 = arith.mulf %249, %247 : vector<8x128xf32>
    %251 = arith.mulf %242, %217 : vector<8x128xf32>
    %252 = arith.addf %250, %251 : vector<8x128xf32>
    %253 = arith.index_cast %221 : i32 to index
    %c0_59 = arith.constant 0 : index
    %254 = vector.load %arg6[%253, %c0_59] : memref<64x128xf32, #tpu.memory_space<vmem>>, vector<8x128xf32>
    tpu.vector_store %arg6[%253, %c0_59], %252 {strides = array<i32>} : memref<64x128xf32, #tpu.memory_space<vmem>>, vector<8x128xf32>,
    %c7_i32 = arith.constant 7 : i32
    %c8_i32_60 = arith.constant 8 : i32
    %255 = arith.muli %c7_i32, %c8_i32_60 : i32
    %256 = tpu.assume_multiple %255, 8 : i32
    %257 = arith.index_cast %256 : i32 to index
    %c0_61 = arith.constant 0 : index
    %258 = vector.load %arg7[%257, %c0_61] : memref<64x384xf32, #tpu.memory_space<vmem>>, vector<8x384xf32>
    %cst_62 = arith.constant dense<0.000000e+00> : vector<8x384xf32>
    %259 = tpu.matmul %252, %7, %cst_62 {dimension_numbers = #tpu.dot_dimension_numbers<[1], [0], [0], [1], [0, 0, 1, 1], [], []>} : vector<8x128xf32>, vector<128x384xf32>, vector<8x384xf32> -> vector<8x384xf32>
    %260 = vector.broadcast %8 : vector<1x384xf32> to vector<8x384xf32>
    %261 = arith.addf %259, %260 : vector<8x384xf32>
    %262 = vector.extract_strided_slice %258 {offsets = [0, 0], sizes = [8, 128], strides = [1, 1]} : vector<8x384xf32> to vector<8x128xf32>
    %263 = vector.extract_strided_slice %261 {offsets = [0, 0], sizes = [8, 128], strides = [1, 1]} : vector<8x384xf32> to vector<8x128xf32>
    %264 = arith.addf %262, %263 : vector<8x128xf32>
    %265 = arith.negf %264 : vector<8x128xf32>
    %266 = math.exp %265 : vector<8x128xf32>
    %cst_63 = arith.constant 1.000000e+00 : f32
    %267 = vector.broadcast %cst_63 : f32 to vector<8x128xf32>
    %268 = arith.addf %267, %266 : vector<8x128xf32>
    %269 = arith.divf %267, %268 : vector<8x128xf32>
    %270 = vector.extract_strided_slice %258 {offsets = [0, 128], sizes = [8, 128], strides = [1, 1]} : vector<8x384xf32> to vector<8x128xf32>
    %271 = vector.extract_strided_slice %261 {offsets = [0, 128], sizes = [8, 128], strides = [1, 1]} : vector<8x384xf32> to vector<8x128xf32>
    %272 = arith.addf %270, %271 : vector<8x128xf32>
    %273 = arith.negf %272 : vector<8x128xf32>
    %274 = math.exp %273 : vector<8x128xf32>
    %cst_64 = arith.constant 1.000000e+00 : f32
    %275 = vector.broadcast %cst_64 : f32 to vector<8x128xf32>
    %276 = arith.addf %275, %274 : vector<8x128xf32>
    %277 = arith.divf %275, %276 : vector<8x128xf32>
    %278 = vector.extract_strided_slice %258 {offsets = [0, 256], sizes = [8, 128], strides = [1, 1]} : vector<8x384xf32> to vector<8x128xf32>
    %279 = vector.extract_strided_slice %261 {offsets = [0, 256], sizes = [8, 128], strides = [1, 1]} : vector<8x384xf32> to vector<8x128xf32>
    %280 = arith.mulf %269, %279 : vector<8x128xf32>
    %281 = arith.addf %278, %280 : vector<8x128xf32>
    %282 = math.tanh %281 : vector<8x128xf32>
    %cst_65 = arith.constant 1.000000e+00 : f32
    %283 = vector.broadcast %cst_65 : f32 to vector<8x128xf32>
    %284 = arith.subf %283, %277 : vector<8x128xf32>
    %285 = arith.mulf %284, %282 : vector<8x128xf32>
    %286 = arith.mulf %277, %252 : vector<8x128xf32>
    %287 = arith.addf %285, %286 : vector<8x128xf32>
    %288 = arith.index_cast %256 : i32 to index
    %c0_66 = arith.constant 0 : index
    %289 = vector.load %arg6[%288, %c0_66] : memref<64x128xf32, #tpu.memory_space<vmem>>, vector<8x128xf32>
    tpu.vector_store %arg6[%288, %c0_66], %287 {strides = array<i32>} : memref<64x128xf32, #tpu.memory_space<vmem>>, vector<8x128xf32>,
    %c8_i32_67 = arith.constant 8 : i32
    return
  }
  func.func @transform_0(%arg0: i32) -> (i32, i32) {
    %c0_i32 = arith.constant 0 : i32
    %c0_i32_0 = arith.constant 0 : i32
    %c0_i32_1 = arith.constant 0 : i32
    return %c0_i32, %c0_i32_0 : i32, i32
  }
  func.func @transform_1(%arg0: i32) -> (i32, i32) {
    %c0_i32 = arith.constant 0 : i32
    %c0_i32_0 = arith.constant 0 : i32
    %c0_i32_1 = arith.constant 0 : i32
    return %c0_i32, %c0_i32_0 : i32, i32
  }
  func.func @transform_2(%arg0: i32) -> (i32, i32) {
    %c0_i32 = arith.constant 0 : i32
    %c0_i32_0 = arith.constant 0 : i32
    %c0_i32_1 = arith.constant 0 : i32
    return %c0_i32, %c0_i32_0 : i32, i32
  }
  func.func @transform_3(%arg0: i32) -> (i32, i32) {
    %c0_i32 = arith.constant 0 : i32
    %c0_i32_0 = arith.constant 0 : i32
    %c0_i32_1 = arith.constant 0 : i32
    return %c0_i32, %c0_i32_0 : i32, i32
  }
  func.func @transform_4(%arg0: i32) -> (i32, i32) {
    %c0_i32 = arith.constant 0 : i32
    %c0_i32_0 = arith.constant 0 : i32
    %c0_i32_1 = arith.constant 0 : i32
    return %c0_i32, %c0_i32_0 : i32, i32
  }
  func.func @transform_5(%arg0: i32) -> (i32, i32) {
    %c0_i32 = arith.constant 0 : i32
    %c0_i32_0 = arith.constant 0 : i32
    %c0_i32_1 = arith.constant 0 : i32
    return %c0_i32, %c0_i32_0 : i32, i32
  }
}

</mosaic_0001>

<bundles_post_ra>
// kernel: tpu_custom_call.1
= control target key start
LH: loop header
LB: loop body
LE: loop exit
PB: predicated region body
PF: predicated region fallthrough
CT: control target
= control target key end

     0   :  { %10 = vsyncpa [#allocation4], 0  ;;  %s3431_s0 = inlined_call_operand.vmem [shape: f32[64,16], index: 0, kind: input, shape index: {}]   ;;  %s3432_s1 = inlined_call_operand.vmem [shape: f32[16,384], index: 1, kind: input, shape index: {}]   ;;  %s3433_s2 = inlined_call_operand.hbm [shape: f32[128,384], index: 2, kind: input, shape index: {}]   ;;  %s3434_s3 = inlined_call_operand.vmem [shape: f32[1,384], index: 3, kind: input, shape index: {}]   ;;  %s3435_s4 = inlined_call_operand.vmem [shape: f32[1,384], index: 4, kind: input, shape index: {}]   ;;  %s3436_s5 = inlined_call_operand.hbm [shape: f32[64,128], index: 5, kind: output, shape index: {}]  }
   0x1   :  { %11 = vsyncpa [#allocation5], 0  ;;  %s2435_s18 = smov [#allocation3]  }
   0x2   :  { %s21_s19 = sshll.u32 %s2435_s18, 4  ;;  %s22_s19 = int_to_ptr.vmem [resolvable:$true] %s21_s19 }
   0x3   :  { %s2399_s20 = scalar_lea.vmem %s22_s19, 6144  ;;  %p2404_p1 = scmp.lt.s32.totalorder %s22_s19, %s22_s19 }
   0x4   :  { %p2400_p0 = scmp.ne.s32.totalorder %s22_s19, %s2399_s20  ;;  %p2405_p2 = scmp.lt.s32.totalorder %s2399_s20, %s2399_s20 }
   0x6   :  { %p2406_p3 = por %p2405_p2, %p2404_p1 }
   0x8   :  { %p2407_p4 = pnand %p2406_p3, %p2400_p0 }
   0xa   :  { %2410 = shalt.err (!%p2407_p4)
}
   0xb   :  { %s2436_s21 = smov 384   ;;  %s2437_s22 = smov 24  }
   0xc   :  { %27 = dma.hbm_to_vmem [thread:$0]  %s3433_s2, 6144, %s22_s19, [#allocation4], %s2436_s21, %s2436_s21, %s2437_s22  }
   0xd   :  { %2431 = dma.done.wait [#allocation4], 6144  }
   0xe   :  { %2432 = vsyncadd [#allocation4], 4294961152  ;;  %v3437_v0 = vmov 0.0   ;;  %v47_v1 = vld [vmem:[%s3432_s1 + $0x20] sm:$0xff]  ;;  %v46_v2 = vld [vmem:[%s3432_s1 + $0x18] sm:$0xff]  ;;  %vm66_vm0 = vcmask 130048   ;;  %v51_v63 = vlaneseq }
   0xf   :  { %155 = vmatprep.mubr.f32.mxu0 %v3437_v0  ;;  %v44_v3 = vld [vmem:[%s3432_s1 + $0x8] sm:$0xff]  ;;  %119 = vmatprep.subr.mxu0 %v47_v1  ;;  %v43_v4 = vld [vmem:[%s3432_s1] sm:$0xff]  ;;  %v2492_v6 = vld [vmem:[#allocation3 + $0x170] sm:$0xff]  ;;  %vm2439_vm1 = vmmov 0  }
  0x10   :  { %v35_v5 = vld [vmem:[%s3431_s0] sm:$0xff]  ;;  %120 = vmatpush1.msra.mxu0 %v46_v2  ;;  %3465 = vst [vmem:[#allocation9_spill] sm:$0xff] %v2492_v6  ;;  %v2495_v7 = vld [vmem:[#allocation3 + $0x168] sm:$0xff]  ;;  %v2497_v8 = vld [vmem:[#allocation3 + $0x158] sm:$0xff]  ;;  %v2792_v1 = vshrl.u32 %v51_v63, 7 }
  0x11   :  { %1963 = vmatprep.mubr.msk.f32.mxu1 %vm66_vm0, %v35_v5  ;;  %121 = vmatprep.subr.mxu0 %v44_v3  ;;  %v2501_v9 = vld [vmem:[#allocation3 + $0x150] sm:$0xff]  ;;  %v36_v10 = vld [vmem:[%s3431_s0 + $0x8] sm:$0xff]  ;;  %v2508_v11 = vld [vmem:[#allocation3 + $0x140] sm:$0xff] }
  0x12   :  { %122 = vmatpush1.msra.mxu0 %v43_v4  ;;  %v2511_v12 = vld [vmem:[#allocation3 + $0x138] sm:$0xff]  ;;  %v2514_v13 = vld [vmem:[#allocation3 + $0x128] sm:$0xff]  ;;  %v2518_v14 = vld [vmem:[#allocation3 + $0x120] sm:$0xff]  ;;  %v53_v2 = vsub.s32 0, %v2792_v1 }
  0x13   :  { %1781 = vmatmul.mubr.msk.f32.vlgmr.msra.gmra.mxu0 %vm66_vm0, %v35_v5  ;;  %404 = vmatprep.subr.mxu0 %v2492_v6  ;;  %v2525_v15 = vld [vmem:[%s3431_s0 + $0x10] sm:$0xff]  ;;  %v2530_v17 = vld [vmem:[#allocation3 + $0x108] sm:$0xff]  ;;  %v2533_v18 = vld [vmem:[#allocation3 + $0xf8] sm:$0xff]  ;;  %v57_v5 = vsub.s32 1, %v2792_v1 }
  0x14   :  { %405 = vmatpush1.msra.mxu0 %v2495_v7  ;;  %161 = vmatprep.mubr.f32.mxu0 %v3437_v0  ;;  %v2527_v16 = vld [vmem:[#allocation3 + $0x110] sm:$0xff]  ;;  %v48_v20 = vld [vmem:[%s3432_s1 + $0x28] sm:$0xff]  ;;  %v2548_v21 = vld [vmem:[%s3431_s0 + $0x18] sm:$0xff] }
  0x15   :  { %406 = vmatprep.subr.mxu0 %v2497_v8  ;;  %v2538_v19 = vld [vmem:[#allocation3 + $0xf0] sm:$0xff]  ;;  %v2550_v22 = vld [vmem:[#allocation3 + $0xe0] sm:$0xff]  ;;  %v2553_v23 = vld [vmem:[#allocation3 + $0xd8] sm:$0xff]  ;;  %1959 = vmatprep.subr.mxu1 %v48_v20 }
  0x16   :  { %407 = vmatpush1.msra.mxu0 %v2501_v9  ;;  %v2556_v24 = vld [vmem:[#allocation3 + $0xc8] sm:$0xff]  ;;  %1960 = vmatpush3.msra.mxu1 %v48_v20  ;;  %v45_v25 = vld [vmem:[%s3432_s1 + $0x10] sm:$0xff]  ;;  %v2564_v26 = vld [vmem:[#allocation3 + $0xc0] sm:$0xff] }
  0x17   :  { %1782 = vmatmul.mubr.msk.f32.gmra.mxu0 %vm66_vm0, %v36_v10  ;;  %408 = vmatprep.subr.mxu0 %v2508_v11  ;;  %v2571_v27 = vld [vmem:[%s3431_s0 + $0x20] sm:$0xff]  ;;  %v2573_v28 = vld [vmem:[#allocation3 + $0xb0] sm:$0xff]  ;;  %v2576_v29 = vld [vmem:[#allocation3 + $0xa8] sm:$0xff] }
  0x18   :  { %409 = vmatpush1.msra.mxu0 %v2511_v12  ;;  %167 = vmatprep.mubr.f32.mxu0 %v3437_v0  ;;  %v2579_v30 = vld [vmem:[#allocation3 + $0x98] sm:$0xff]  ;;  %v2584_v31 = vld [vmem:[#allocation3 + $0x90] sm:$0xff]  ;;  %v2591_v32 = vld [vmem:[%s3431_s0 + $0x28] sm:$0xff] }
  0x19   :  { %410 = vmatprep.subr.mxu0 %v2514_v13  ;;  %1961 = vmatprep.subr.mxu1 %v45_v25  ;;  %v2593_v33 = vld [vmem:[#allocation3 + $0x80] sm:$0xff]  ;;  %v2596_v34 = vld [vmem:[#allocation3 + $0x78] sm:$0xff]  ;;  %v2600_v35 = vld [vmem:[#allocation3 + $0x68] sm:$0xff] }
  0x1a   :  { %411 = vmatpush1.msra.mxu0 %v2518_v14  ;;  %1962 = vmatpush3.msra.mxu1 %v45_v25  ;;  %v2603_v36 = vld [vmem:[#allocation3 + $0x178] sm:$0xff]  ;;  %v2608_v37 = vld [vmem:[#allocation3 + $0x60] sm:$0xff]  ;;  %v41_v38 = vld [vmem:[%s3431_s0 + $0x30] sm:$0xff] }
  0x1b   :  { %1783 = vmatmul.mubr.msk.f32.gmra.mxu0 %vm66_vm0, %v2525_v15  ;;  %412 = vmatprep.subr.mxu0 %v2527_v16  ;;  %v2615_v39 = vld [vmem:[#allocation3 + $0x50] sm:$0xff]  ;;  %v2618_v40 = vld [vmem:[#allocation3 + $0x48] sm:$0xff]  ;;  %v2622_v41 = vld [vmem:[#allocation3 + $0x38] sm:$0xff] }
  0x1c   :  { %413 = vmatpush1.msra.mxu0 %v2530_v17  ;;  %173 = vmatprep.mubr.f32.mxu0 %v3437_v0  ;;  %v2625_v42 = vld [vmem:[#allocation3 + $0x160] sm:$0xff]  ;;  %v2629_v43 = vld [vmem:[#allocation3 + $0x30] sm:$0xff]  ;;  %v42_v44 = vld [vmem:[%s3431_s0 + $0x38] sm:$0xff] }
  0x1d   :  { %414 = vmatprep.subr.mxu0 %v2533_v18  ;;  %1975 = vmatprep.subr.mxu1 %v3437_v0  ;;  %v2636_v45 = vld [vmem:[#allocation3 + $0x20] sm:$0xff]  ;;  %v2639_v46 = vld [vmem:[#allocation3 + $0x18] sm:$0xff]  ;;  %v2643_v47 = vld [vmem:[#allocation3 + $0x8] sm:$0xff] }
  0x1e   :  { %415 = vmatpush1.msra.mxu0 %v2538_v19  ;;  %1964 = vmatmul.mubr.msk.f32.vlgmr.msra.gmra.mxu1 %vm66_vm0, %v36_v10  ;;  %3466 = vst [vmem:[#allocation10_spill] sm:$0xff] %v2636_v45  ;;  %3467 = vst [vmem:[#allocation11_spill] sm:$0xff] %v2639_v46  ;;  %v2646_v48 = vld [vmem:[#allocation3 + $0x148] sm:$0xff]  ;;  %v2650_v49 = vld [vmem:[#allocation3] sm:$0xff] }
  0x1f   :  { %1784 = vmatmul.mubr.msk.f32.gmra.mxu0 %vm66_vm0, %v2548_v21  ;;  %416 = vmatprep.subr.mxu0 %v2550_v22  ;;  %3468 = vst [vmem:[#allocation12_spill] sm:$0xff] %v2643_v47  ;;  %3469 = vst [vmem:[#allocation13_spill] sm:$0xff] %v2650_v49  ;;  %v2654_v50 = vld [vmem:[#allocation3 + $0x130] sm:$0xff]  ;;  %v2660_v51 = vld [vmem:[#allocation3 + $0x118] sm:$0xff] }
  0x20   :  { %417 = vmatpush1.msra.mxu0 %v2553_v23  ;;  %179 = vmatprep.mubr.f32.mxu0 %v3437_v0  ;;  %v2665_v52 = vld [vmem:[#allocation3 + $0x100] sm:$0xff]  ;;  %v2672_v53 = vld [vmem:[#allocation3 + $0xe8] sm:$0xff]  ;;  %v2680_v54 = vld [vmem:[#allocation3 + $0xd0] sm:$0xff] }
  0x21   :  { %418 = vmatprep.subr.mxu0 %v2556_v24  ;;  %1976 = vmatpush3.msra.mxu1 %v2603_v36  ;;  %v2686_v55 = vld [vmem:[#allocation3 + $0xb8] sm:$0xff]  ;;  %v2693_v56 = vld [vmem:[#allocation3 + $0xa0] sm:$0xff]  ;;  %v2699_v57 = vld [vmem:[#allocation3 + $0x88] sm:$0xff] }
  0x22   :  { %419 = vmatpush1.msra.mxu0 %v2564_v26  ;;  %1977 = vmatprep.subr.mxu1 %v3437_v0  ;;  %v2706_v58 = vld [vmem:[#allocation3 + $0x70] sm:$0xff]  ;;  %v2712_v59 = vld [vmem:[#allocation3 + $0x58] sm:$0xff]  ;;  %v2718_v60 = vld [vmem:[#allocation3 + $0x40] sm:$0xff] }
  0x23   :  { %1785 = vmatmul.mubr.msk.f32.gmra.mxu0 %vm66_vm0, %v2571_v27  ;;  %420 = vmatprep.subr.mxu0 %v2573_v28  ;;  %3470 = vst [vmem:[#allocation14_spill] sm:$0xff] %v2718_v60  ;;  %v2724_v61 = vld [vmem:[#allocation3 + $0x28] sm:$0xff]  ;;  %v2730_v62 = vld [vmem:[#allocation3 + $0x10] sm:$0xff]  ;;  %v49_v3 = vld [vmem:[%s3434_s3] sm:$0x7] }
  0x24   :  { %421 = vmatpush1.msra.mxu0 %v2576_v29  ;;  %185 = vmatprep.mubr.f32.mxu0 %v3437_v0  ;;  %3471 = vst [vmem:[#allocation15_spill] sm:$0xff] %v2724_v61  ;;  %3472 = vst [vmem:[#allocation16_spill] sm:$0xff] %v2730_v62 }
  0x25   :  { %422 = vmatprep.subr.mxu0 %v2579_v30  ;;  %1978 = vmatpush3.msra.mxu1 %v2625_v42 }
  0x26   :  { %423 = vmatpush1.msra.mxu0 %v2584_v31  ;;  %1979 = vmatprep.subr.mxu1 %v3437_v0 }
  0x27   :  { %1786 = vmatmul.mubr.msk.f32.gmra.mxu0 %vm66_vm0, %v2591_v32  ;;  %424 = vmatprep.subr.mxu0 %v2593_v33 }
  0x28   :  { %425 = vmatpush1.msra.mxu0 %v2596_v34  ;;  %191 = vmatprep.mubr.f32.mxu0 %v3437_v0 }
  0x29   :  { %426 = vmatprep.subr.mxu0 %v2600_v35  ;;  %1980 = vmatpush3.msra.mxu1 %v2646_v48 }
  0x2a   :  { %427 = vmatpush1.msra.mxu0 %v2608_v37  ;;  %1981 = vmatprep.subr.mxu1 %v3437_v0 }
  0x2b   :  { %1787 = vmatmul.mubr.msk.f32.gmra.mxu0 %vm66_vm0, %v41_v38  ;;  %428 = vmatprep.subr.mxu0 %v2615_v39 }
  0x2c   :  { %429 = vmatpush1.msra.mxu0 %v2618_v40  ;;  %197 = vmatprep.mubr.f32.mxu0 %v3437_v0 }
  0x2d   :  { %430 = vmatprep.subr.mxu0 %v2622_v41  ;;  %1982 = vmatpush3.msra.mxu1 %v2654_v50 }
  0x2e   :  { %431 = vmatpush1.msra.mxu0 %v2629_v43  ;;  %1983 = vmatprep.subr.mxu1 %v3437_v0 }
  0x2f   :  { %1788 = vmatmul.mubr.msk.f32.gmra.mxu0 %vm66_vm0, %v42_v44  ;;  %432 = vmatprep.subr.mxu0 %v2636_v45 }
  0x30   :  { %433 = vmatpush1.msra.mxu0 %v2639_v46  ;;  %468 = vmatprep.mubr.f32.mxu0 %v3437_v0 }
  0x31   :  { %434 = vmatprep.subr.mxu0 %v2643_v47  ;;  %1966 = vmatprep.mubr.msk.f32.mxu1 %vm66_vm0, %v2525_v15  ;;  %v54_v15 = vrot.slane %v49_v3, %v53_v2 }
  0x32   :  { %435 = vmatpush1.msra.mxu0 %v2650_v49  ;;  %1984 = vmatpush3.msra.mxu1 %v2660_v51 }
  0x33   :  { %469 = vmatmul.mubr.f32.vlgmr.msra.gmra.mxu0 %v3437_v0  ;;  %573 = vmatprep.subr.mxu0 %v2492_v6 }
  0x34   :  { %1985 = vmatprep.subr.mxu1 %v3437_v0  ;;  %1967 = vmatmul.mubr.msk.f32.gmra.mxu1 %vm66_vm0, %v2548_v21  ;;  %v58_v21 = vrot.slane %v49_v3, %v57_v5 }
  0x35   :  { %1986 = vmatpush3.msra.mxu1 %v2665_v52  ;;  %1969 = vmatprep.mubr.msk.f32.mxu1 %vm66_vm0, %v2571_v27 }
  0x36   :  { %1987 = vmatprep.subr.mxu1 %v3437_v0  ;;  %574 = vmatpush1.msra.mxu0 %v2495_v7 }
  0x37   :  { %1988 = vmatpush3.msra.mxu1 %v2672_v53  ;;  %575 = vmatprep.subr.mxu0 %v2497_v8 }
  0x38   :  { %1989 = vmatprep.subr.mxu1 %v3437_v0  ;;  %1970 = vmatmul.mubr.msk.f32.gmra.mxu1 %vm66_vm0, %v2591_v32 }
  0x39   :  { %1990 = vmatpush3.msra.mxu1 %v2680_v54  ;;  %1972 = vmatprep.mubr.msk.f32.mxu1 %vm66_vm0, %v41_v38 }
  0x3a   :  { %1991 = vmatprep.subr.mxu1 %v3437_v0  ;;  %576 = vmatpush1.msra.mxu0 %v2501_v9 }
  0x3b   :  { %1992 = vmatpush3.msra.mxu1 %v2686_v55  ;;  %577 = vmatprep.subr.mxu0 %v2508_v11 }
  0x3c   :  { %1993 = vmatprep.subr.mxu1 %v3437_v0  ;;  %1973 = vmatmul.mubr.msk.f32.gmra.mxu1 %vm66_vm0, %v42_v44 }
  0x3d   :  { %1994 = vmatpush3.msra.mxu1 %v2693_v56  ;;  %2007 = vmatprep.mubr.msk.f32.mxu1 %vm2439_vm1, %v3437_v0 }
  0x3e   :  { %1995 = vmatprep.subr.mxu1 %v3437_v0  ;;  %578 = vmatpush1.msra.mxu0 %v2511_v12 }
  0x3f   :  { %1996 = vmatpush3.msra.mxu1 %v2699_v57  ;;  %579 = vmatprep.subr.mxu0 %v2514_v13 }
  0x40   :  { %1997 = vmatprep.subr.mxu1 %v3437_v0  ;;  %580 = vmatpush1.msra.mxu0 %v2518_v14 }
  0x41   :  { %1998 = vmatpush3.msra.mxu1 %v2706_v58  ;;  %581 = vmatprep.subr.mxu0 %v2527_v16 }
  0x42   :  { %1999 = vmatprep.subr.mxu1 %v3437_v0  ;;  %582 = vmatpush1.msra.mxu0 %v2530_v17 }
  0x43   :  { %2000 = vmatpush3.msra.mxu1 %v2712_v59  ;;  %583 = vmatprep.subr.mxu0 %v2533_v18 }
  0x44   :  { %2001 = vmatprep.subr.mxu1 %v3437_v0  ;;  %584 = vmatpush1.msra.mxu0 %v2538_v19 }
  0x45   :  { %2002 = vmatpush3.msra.mxu1 %v2718_v60  ;;  %585 = vmatprep.subr.mxu0 %v2550_v22 }
  0x46   :  { %2003 = vmatprep.subr.mxu1 %v3437_v0  ;;  %586 = vmatpush1.msra.mxu0 %v2553_v23 }
  0x47   :  { %2004 = vmatpush3.msra.mxu1 %v2724_v61  ;;  %587 = vmatprep.subr.mxu0 %v2556_v24 }
  0x48   :  { %2005 = vmatprep.subr.mxu1 %v3437_v0  ;;  %588 = vmatpush1.msra.mxu0 %v2564_v26 }
  0x49   :  { %2006 = vmatpush3.msra.mxu1 %v2730_v62  ;;  %589 = vmatprep.subr.mxu0 %v2573_v28 }
  0x4a   :  { %2008 = vmatmul.mubr.f32.vlgmr.msra.gmra.mxu1 %v3437_v0  ;;  %2010 = vmatprep.subr.mxu1 %v3437_v0 }
  0x4b   :  { %2011 = vmatpush3.msra.mxu1 %v2603_v36  ;;  %590 = vmatpush1.msra.mxu0 %v2576_v29 }
  0x4c   :  { %2012 = vmatprep.subr.mxu1 %v3437_v0  ;;  %591 = vmatprep.subr.mxu0 %v2579_v30 }
  0x4d   :  { %2013 = vmatpush3.msra.mxu1 %v2625_v42  ;;  %592 = vmatpush1.msra.mxu0 %v2584_v31 }
  0x4e   :  { %2014 = vmatprep.subr.mxu1 %v3437_v0  ;;  %593 = vmatprep.subr.mxu0 %v2593_v33 }
  0x4f   :  { %2015 = vmatpush3.msra.mxu1 %v2646_v48  ;;  %594 = vmatpush1.msra.mxu0 %v2596_v34 }
  0x50   :  { %2016 = vmatprep.subr.mxu1 %v3437_v0  ;;  %595 = vmatprep.subr.mxu0 %v2600_v35 }
  0x51   :  { %2017 = vmatpush3.msra.mxu1 %v2654_v50  ;;  %596 = vmatpush1.msra.mxu0 %v2608_v37 }
  0x52   :  { %2018 = vmatprep.subr.mxu1 %v3437_v0  ;;  %597 = vmatprep.subr.mxu0 %v2615_v39 }
  0x53   :  { %2019 = vmatpush3.msra.mxu1 %v2660_v51  ;;  %598 = vmatpush1.msra.mxu0 %v2618_v40 }
  0x54   :  { %2020 = vmatprep.subr.mxu1 %v3437_v0  ;;  %599 = vmatprep.subr.mxu0 %v2622_v41 }
  0x55   :  { %2021 = vmatpush3.msra.mxu1 %v2665_v52  ;;  %600 = vmatpush1.msra.mxu0 %v2629_v43 }
  0x56   :  { %2022 = vmatprep.subr.mxu1 %v3437_v0  ;;  %601 = vmatprep.subr.mxu0 %v2636_v45 }
  0x57   :  { %2023 = vmatpush3.msra.mxu1 %v2672_v53  ;;  %602 = vmatpush1.msra.mxu0 %v2639_v46 }
  0x58   :  { %2024 = vmatprep.subr.mxu1 %v3437_v0  ;;  %603 = vmatprep.subr.mxu0 %v2643_v47 }
  0x59   :  { %2025 = vmatpush3.msra.mxu1 %v2680_v54  ;;  %604 = vmatpush1.msra.mxu0 %v2650_v49 }
  0x5a   :  { %2026 = vmatprep.subr.mxu1 %v3437_v0  ;;  %637 = vmatprep.mubr.f32.mxu0 %v3437_v0 }
  0x5b   :  { %2027 = vmatpush3.msra.mxu1 %v2686_v55  ;;  %2042 = vmatprep.mubr.msk.f32.mxu1 %vm2439_vm1, %v3437_v0 }
  0x5c   :  { %2028 = vmatprep.subr.mxu1 %v3437_v0  ;;  %743 = vmatprep.subr.mxu0 %v2492_v6 }
  0x5d   :  { %2029 = vmatpush3.msra.mxu1 %v2693_v56 }
  0x5e   :  { %2030 = vmatprep.subr.mxu1 %v3437_v0 }
  0x5f   :  { %2031 = vmatpush3.msra.mxu1 %v2699_v57 }
  0x60   :  { %2032 = vmatprep.subr.mxu1 %v3437_v0 }
  0x61   :  { %2033 = vmatpush3.msra.mxu1 %v2706_v58 }
  0x62   :  { %2034 = vmatprep.subr.mxu1 %v3437_v0 }
  0x63   :  { %2035 = vmatpush3.msra.mxu1 %v2712_v59 }
  0x64   :  { %2036 = vmatprep.subr.mxu1 %v3437_v0 }
  0x65   :  { %2037 = vmatpush3.msra.mxu1 %v2718_v60 }
  0x66   :  { %2038 = vmatprep.subr.mxu1 %v3437_v0 }
  0x67   :  { %2039 = vmatpush3.msra.mxu1 %v2724_v61 }
  0x68   :  { %2040 = vmatprep.subr.mxu1 %v3437_v0 }
  0x69   :  { %2041 = vmatpush3.msra.mxu1 %v2730_v62  ;;  %v61_v62 = vsub.s32 2, %v2792_v1 }
  0x6a   :  { %2045 = vmatprep.subr.mxu1 %v3437_v0 }
  0xd3   :  { %v157_v4 = vpop.f32.mrf.mxu0 }
  0xd5   :  { %v159_v10 = vpop.f32.mrf.mxu0 }
  0xd7   :  { %v163_v20 = vpop.f32.mrf.mxu0 }
  0xd8   :  { %v2799_v25 = vadd.f32 %v163_v20, %v54_v15  ;;  %v62_v20 = vrot.slane %v49_v3, %v61_v62 }
  0xd9   :  { %v165_v27 = vpop.f32.mrf.mxu0 }
  0xda   :  { %3473 = vst [vmem:[#allocation17_spill] sm:$0xff] %v2799_v25  ;;  %v2801_v32 = vadd.f32 %v165_v27, %v58_v21 }
  0xdb   :  { %v169_v38 = vpop.f32.mrf.mxu0 }
  0xdc   :  { %3474 = vst [vmem:[#allocation18_spill] sm:$0xff] %v2801_v32  ;;  %v2803_v44 = vadd.f32 %v169_v38, %v54_v15 }
  0xdd   :  { %v171_v63 = vpop.f32.mrf.mxu0 }
  0xde   :  { %3475 = vst [vmem:[#allocation19_spill] sm:$0xff] %v2803_v44  ;;  %v2805_v0 = vadd.f32 %v171_v63, %v58_v21  ;;  %v1965_v38 = vpop.f32.mrf.mxu1 }
  0xdf   :  { %v175_v6 = vpop.f32.mrf.mxu0  ;;  %v2816_v45 = vadd.f32 %v1965_v38, %v62_v20 }
  0xe0   :  { %3476 = vst [vmem:[#allocation20_spill] sm:$0xff] %v2805_v0  ;;  %v2808_v49 = vadd.f32 %v175_v6, %v54_v15 }
  0xe1   :  { %v177_v47 = vpop.f32.mrf.mxu0  ;;  %3481 = vst [vmem:[#allocation25_spill] sm:$0xff] %v2816_v45 }
  0xe2   :  { %3477 = vst [vmem:[#allocation21_spill] sm:$0xff] %v2808_v49  ;;  %v2810_v61 = vadd.f32 %v177_v47, %v58_v21 }
  0xe3   :  { %v181_v46 = vpop.f32.mrf.mxu0 }
  0xe4   :  { %3478 = vst [vmem:[#allocation22_spill] sm:$0xff] %v2810_v61  ;;  %v2812_v25 = vadd.f32 %v181_v46, %v54_v15  ;;  %v381_v46 = vld [vmem:[%s3435_s4] sm:$0x7]  ;;  %s2440_s4 = smov [#allocation6]  }
  0xe5   :  { %v183_v27 = vpop.f32.mrf.mxu0  ;;  %v2831_v38 = vrot.slane %v381_v46, %v53_v2  ;;  %s1762_s28 = sshll.u32 %s2440_s4, 4  ;;  %s1763_s28 = int_to_ptr.vmem [resolvable:$true] %s1762_s28 }
  0xe6   :  { %3479 = vst [vmem:[#allocation23_spill] sm:$0xff] %v2812_v25  ;;  %v2814_v32 = vadd.f32 %v183_v27, %v58_v21  ;;  %v270_v25 = vpop.f32.mrf.mxu1  ;;  %s2411_s29 = scalar_lea.vmem %s1763_s28, 1024  ;;  %p2416_p6 = scmp.lt.s32.totalorder %s1763_s28, %s1763_s28 }
  0xe7   :  { %v187_v44 = vpop.f32.mrf.mxu0  ;;  %3487 = vst [vmem:[#allocation31_spill] sm:$0xff] %v2831_v38  ;;  %p2412_p5 = scmp.ne.s32.totalorder %s1763_s28, %s2411_s29  ;;  %p2417_p7 = scmp.lt.s32.totalorder %s2411_s29, %s2411_s29 }
  0xe8   :  { %3480 = vst [vmem:[#allocation24_spill] sm:$0xff] %v2814_v32  ;;  %v2818_v63 = vadd.f32 %v187_v44, %v54_v15 }
  0xe9   :  { %v189_v0 = vpop.f32.mrf.mxu0  ;;  %p2418_p8 = por %p2417_p7, %p2416_p6 }
  0xea   :  { %3482 = vst [vmem:[#allocation26_spill] sm:$0xff] %v2818_v63  ;;  %v2820_v1 = vadd.f32 %v189_v0, %v58_v21 }
  0xeb   :  { %v193_v6 = vpop.f32.mrf.mxu0  ;;  %p2419_p9 = pnand %p2418_p8, %p2412_p5 }
  0xec   :  { %3483 = vst [vmem:[#allocation27_spill] sm:$0xff] %v2820_v1  ;;  %v2822_v49 = vadd.f32 %v193_v6, %v54_v15  ;;  %v158_v1 = vadd.f32 %v157_v4, %v54_v15 }
  0xed   :  { %v195_v47 = vpop.f32.mrf.mxu0 }
  0xee   :  { %3484 = vst [vmem:[#allocation28_spill] sm:$0xff] %v2822_v49  ;;  %v2827_v3 = vadd.f32 %v195_v47, %v58_v21  ;;  %v2836_v49 = vrot.slane %v381_v46, %v57_v5 }
  0xef   :  { %v199_v27 = vpop.f32.mrf.mxu0 }
  0xf0   :  { %3485 = vst [vmem:[#allocation29_spill] sm:$0xff] %v2827_v3  ;;  %v2829_v32 = vadd.f32 %v199_v27, %v54_v15 }
  0xf1   :  { %v201_v44 = vpop.f32.mrf.mxu0 }
  0xf2   :  { %3486 = vst [vmem:[#allocation30_spill] sm:$0xff] %v2829_v32  ;;  %v2833_v63 = vadd.f32 %v201_v44, %v58_v21  ;;  %v160_v44 = vadd.f32 %v159_v10, %v58_v21 }
  0xf3   :  { %v470_v0 = vpop.f32.mrf.mxu0 }
  0xf4   :  { %3488 = vst [vmem:[#allocation32_spill] sm:$0xff] %v2833_v63  ;;  %v471_v6 = vadd.f32 %v470_v0, %v2831_v38  ;;  %v1968_v60 = vpop.f32.mrf.mxu1 }
  0xf5   :  { %v472_v61 = vpop.f32.mrf.mxu0  ;;  %v2838_v47 = vadd.f32 %v1968_v60, %v62_v20 }
  0xf6   :  { %v545_v45 = vadd.f32 %v471_v6, %v158_v1  ;;  %v473_v27 = vadd.f32 %v472_v61, %v2836_v49  ;;  %v280_v2 = vpop.f32.mrf.mxu1 }
  0xf7   :  { %3489 = vst [vmem:[#allocation33_spill] sm:$0xff] %v2838_v47  ;;  %v2841_v32 = vadd.f32 %v280_v2, %v62_v20  ;;  %v3506_v47 = vld [vmem:[#allocation18_spill] sm:$0xff] }
  0xf8   :  { %v1797_v3 = vmul.f32 -1.442695, %v545_v45  ;;  %v1971_v63 = vpop.f32.mrf.mxu1  ;;  %v552_v15 = vadd.f32 %v473_v27, %v160_v44 }
  0xf9   :  { %3490 = vst [vmem:[#allocation34_spill] sm:$0xff] %v2841_v32  ;;  %v2843_v4 = vadd.f32 %v1971_v63, %v62_v20 }
  0xfa   :  { %2263 = vpow2.f32 %v1797_v3  ;;  %v290_v5 = vpop.f32.mrf.mxu1  ;;  %v1798_v60 = vmul.f32 -1.442695, %v552_v15  ;;  %v2851_v3 = vrot.slane %v381_v46, %v61_v62  ;;  %v3495_v62 = vmov 0.0   ;;  %v3498_v46 = vld [vmem:[#allocation11_spill] sm:$0xff] }
  0xfb   :  { %3491 = vst [vmem:[#allocation35_spill] sm:$0xff] %v2843_v4  ;;  %v2845_v0 = vadd.f32 %v290_v5, %v62_v20 }
  0xfc   :  { %v1974_v38 = vpop.f32.mrf.mxu1  ;;  %2265 = vpow2.f32 %v1798_v60 }
  0xfd   :  { %3492 = vst [vmem:[#allocation36_spill] sm:$0xff] %v2845_v0  ;;  %v2847_v1 = vadd.f32 %v1974_v38, %v62_v20  ;;  %v271_v38 = vadd.f32 %v270_v25, %v62_v20  ;;  %v3496_v25 = vld [vmem:[#allocation14_spill] sm:$0xff] }
  0xfe   :  { %v300_v6 = vpop.f32.mrf.mxu1 }
  0xff   :  { %3493 = vst [vmem:[#allocation37_spill] sm:$0xff] %v2847_v1  ;;  %v2849_v45 = vadd.f32 %v300_v6, %v62_v20  ;;  %v3497_v20 = vld [vmem:[#allocation10_spill] sm:$0xff] }
 0x101   :  { %3494 = vst [vmem:[#allocation38_spill] sm:$0xff] %v2849_v45 }
 0x107   :  { %v2264_v61 = vpop.eup %2263 }
 0x108   :  { %v549_v2 = vadd.f32 1.0, %v2264_v61 }
 0x109   :  { %v2266_v63 = vpop.eup %2265 }
 0x10a   :  { %2267 = vrcp.f32 %v549_v2  ;;  %v541_v10 = vpop.f32.mrf.mxu1  ;;  %v556_v27 = vadd.f32 1.0, %v2266_v63 }
 0x10b   :  { %v542_v44 = vadd.f32 %v541_v10, %v2851_v3  ;;  %v3502_v10 = vld [vmem:[#allocation16_spill] sm:$0xff] }
 0x10c   :  { %v2009_v21 = vpop.f32.mrf.mxu1  ;;  %2269 = vrcp.f32 %v556_v27 }
 0x10d   :  { %v3503_v21 = vld [vmem:[#allocation9_spill] sm:$0xff] }
 0x117   :  { %v2268_v5 = vpop.eup %2267 }
 0x118   :  { %v559_v1 = vmul.f32 %v2268_v5, %v542_v44  ;;  %v3504_v44 = vld [vmem:[#allocation31_spill] sm:$0xff] }
 0x119   :  { %v2270_v6 = vpop.eup %2269 }
 0x11a   :  { %v560_v15 = vadd.f32 %v559_v1, %v271_v38  ;;  %v562_v45 = vsub.f32 1.0, %v2270_v6  ;;  %v564_v61 = vmul.f32 0.0, %v2270_v6  ;;  %v3500_v1 = vld [vmem:[#allocation12_spill] sm:$0xff]  ;;  %v3505_v6 = vld [vmem:[#allocation17_spill] sm:$0xff] }
 0x11c   :  { %2271 = vtanh.f32 %v560_v15 }
 0x129   :  { %v2272_v60 = vpop.eup %2271 }
 0x12a   :  { %v563_v4 = vmul.f32 %v2272_v60, %v562_v45  ;;  %v3501_v45 = vld [vmem:[#allocation13_spill] sm:$0xff] }
 0x12c   :  { %v2854_v2 = vadd.f32 %v564_v61, %v563_v4  ;;  %v3499_v4 = vld [vmem:[#allocation15_spill] sm:$0xff] }
 0x12e   :  { %566 = vst [vmem:[#allocation6] sm:$0xff] %v2854_v2  ;;  %638 = vmatmul.mubr.f32.vlgmr.msra.gmra.mxu0 %v2854_v2  ;;  %2043 = vmatmul.mubr.f32.vlgmr.msra.gmra.mxu1 %v2854_v2 }
 0x12f   :  { %744 = vmatpush1.msra.mxu0 %v2495_v7  ;;  %2046 = vmatpush3.msra.mxu1 %v2603_v36 }
 0x130   :  { %745 = vmatprep.subr.mxu0 %v2497_v8  ;;  %2047 = vmatprep.subr.mxu1 %v3495_v62 }
 0x131   :  { %746 = vmatpush1.msra.mxu0 %v2501_v9  ;;  %2048 = vmatpush3.msra.mxu1 %v2625_v42 }
 0x132   :  { %747 = vmatprep.subr.mxu0 %v2508_v11  ;;  %2049 = vmatprep.subr.mxu1 %v3495_v62 }
 0x133   :  { %748 = vmatpush1.msra.mxu0 %v2511_v12  ;;  %2050 = vmatpush3.msra.mxu1 %v2646_v48 }
 0x134   :  { %749 = vmatprep.subr.mxu0 %v2514_v13  ;;  %2051 = vmatprep.subr.mxu1 %v3495_v62 }
 0x135   :  { %750 = vmatpush1.msra.mxu0 %v2518_v14  ;;  %2052 = vmatpush3.msra.mxu1 %v2654_v50 }
 0x136   :  { %751 = vmatprep.subr.mxu0 %v2527_v16  ;;  %2053 = vmatprep.subr.mxu1 %v3495_v62 }
 0x137   :  { %752 = vmatpush1.msra.mxu0 %v2530_v17  ;;  %2054 = vmatpush3.msra.mxu1 %v2660_v51 }
 0x138   :  { %753 = vmatprep.subr.mxu0 %v2533_v18  ;;  %2055 = vmatprep.subr.mxu1 %v3495_v62 }
 0x139   :  { %754 = vmatpush1.msra.mxu0 %v2538_v19  ;;  %2056 = vmatpush3.msra.mxu1 %v2665_v52 }
 0x13a   :  { %755 = vmatprep.subr.mxu0 %v2550_v22  ;;  %2057 = vmatprep.subr.mxu1 %v3495_v62 }
 0x13b   :  { %756 = vmatpush1.msra.mxu0 %v2553_v23  ;;  %2058 = vmatpush3.msra.mxu1 %v2672_v53 }
 0x13c   :  { %757 = vmatprep.subr.mxu0 %v2556_v24  ;;  %2059 = vmatprep.subr.mxu1 %v3495_v62 }
 0x13d   :  { %758 = vmatpush1.msra.mxu0 %v2564_v26  ;;  %2060 = vmatpush3.msra.mxu1 %v2680_v54 }
 0x13e   :  { %759 = vmatprep.subr.mxu0 %v2573_v28  ;;  %2061 = vmatprep.subr.mxu1 %v3495_v62 }
 0x13f   :  { %760 = vmatpush1.msra.mxu0 %v2576_v29  ;;  %2062 = vmatpush3.msra.mxu1 %v2686_v55 }
 0x140   :  { %761 = vmatprep.subr.mxu0 %v2579_v30  ;;  %2063 = vmatprep.subr.mxu1 %v3495_v62 }
 0x141   :  { %762 = vmatpush1.msra.mxu0 %v2584_v31  ;;  %2064 = vmatpush3.msra.mxu1 %v2693_v56 }
 0x142   :  { %763 = vmatprep.subr.mxu0 %v2593_v33  ;;  %2065 = vmatprep.subr.mxu1 %v3495_v62 }
 0x143   :  { %764 = vmatpush1.msra.mxu0 %v2596_v34  ;;  %2066 = vmatpush3.msra.mxu1 %v2699_v57 }
 0x144   :  { %765 = vmatprep.subr.mxu0 %v2600_v35  ;;  %2067 = vmatprep.subr.mxu1 %v3495_v62 }
 0x145   :  { %766 = vmatpush1.msra.mxu0 %v2608_v37  ;;  %2068 = vmatpush3.msra.mxu1 %v2706_v58 }
 0x146   :  { %767 = vmatprep.subr.mxu0 %v2615_v39  ;;  %2069 = vmatprep.subr.mxu1 %v3495_v62 }
 0x147   :  { %768 = vmatpush1.msra.mxu0 %v2618_v40  ;;  %2070 = vmatpush3.msra.mxu1 %v2712_v59 }
 0x148   :  { %769 = vmatprep.subr.mxu0 %v2622_v41  ;;  %2071 = vmatprep.subr.mxu1 %v3495_v62 }
 0x149   :  { %770 = vmatpush1.msra.mxu0 %v2629_v43  ;;  %2072 = vmatpush3.msra.mxu1 %v3496_v25 }
 0x14a   :  { %771 = vmatprep.subr.mxu0 %v3497_v20  ;;  %2073 = vmatprep.subr.mxu1 %v3495_v62 }
 0x14b   :  { %772 = vmatpush1.msra.mxu0 %v3498_v46  ;;  %2074 = vmatpush3.msra.mxu1 %v3499_v4 }
 0x14c   :  { %773 = vmatprep.subr.mxu0 %v3500_v1  ;;  %2075 = vmatprep.subr.mxu1 %v3495_v62 }
 0x14d   :  { %774 = vmatpush1.msra.mxu0 %v3501_v45  ;;  %807 = vmatprep.mubr.f32.mxu0 %v3495_v62 }
 0x14e   :  { %2076 = vmatpush3.msra.mxu1 %v3502_v10  ;;  %2077 = vmatprep.mubr.msk.f32.mxu1 %vm2439_vm1, %v3495_v62 }
 0x14f   :  { %913 = vmatprep.subr.mxu0 %v3503_v21  ;;  %2080 = vmatprep.subr.mxu1 %v3495_v62 }
 0x1ee   :  { %v639_v63 = vpop.f32.mrf.mxu0  ;;  %v710_v27 = vpop.f32.mrf.mxu1 }
 0x1ef   :  { %v640_v5 = vadd.f32 %v639_v63, %v3504_v44  ;;  %v711_v46 = vadd.f32 %v710_v27, %v2851_v3  ;;  %v3514_v27 = vld [vmem:[#allocation31_spill] sm:$0xff] }
 0x1f0   :  { %v641_v38 = vpop.f32.mrf.mxu0  ;;  %v2044_v15 = vpop.f32.mrf.mxu1 }
 0x1f1   :  { %v714_v60 = vadd.f32 %v640_v5, %v3505_v6  ;;  %v642_v0 = vadd.f32 %v641_v38, %v2836_v49  ;;  %v3507_v15 = vld [vmem:[#allocation25_spill] sm:$0xff] }
 0x1f3   :  { %v1799_v61 = vmul.f32 -1.442695, %v714_v60  ;;  %v721_v32 = vadd.f32 %v642_v0, %v3506_v47  ;;  %v3508_v0 = vld [vmem:[#allocation11_spill] sm:$0xff] }
 0x1f5   :  { %2273 = vpow2.f32 %v1799_v61  ;;  %v1800_v10 = vmul.f32 -1.442695, %v721_v32 }
 0x1f7   :  { %2275 = vpow2.f32 %v1800_v10 }
 0x202   :  { %v2274_v45 = vpop.eup %2273 }
 0x203   :  { %v718_v21 = vadd.f32 1.0, %v2274_v45  ;;  %v3513_v45 = vld [vmem:[#allocation9_spill] sm:$0xff] }
 0x204   :  { %v2276_v1 = vpop.eup %2275 }
 0x205   :  { %2277 = vrcp.f32 %v718_v21  ;;  %v725_v4 = vadd.f32 1.0, %v2276_v1  ;;  %v3512_v1 = vld [vmem:[#allocation16_spill] sm:$0xff] }
 0x207   :  { %2279 = vrcp.f32 %v725_v4  ;;  %v3511_v4 = vld [vmem:[#allocation13_spill] sm:$0xff] }
 0x212   :  { %v2278_v63 = vpop.eup %2277 }
 0x213   :  { %v728_v44 = vmul.f32 %v2278_v63, %v711_v46  ;;  %v3510_v46 = vld [vmem:[#allocation12_spill] sm:$0xff] }
 0x214   :  { %v2280_v6 = vpop.eup %2279 }
 0x215   :  { %v729_v5 = vadd.f32 %v728_v44, %v3507_v15  ;;  %v731_v38 = vsub.f32 1.0, %v2280_v6  ;;  %v733_v32 = vmul.f32 %v2280_v6, %v2854_v2  ;;  %v3509_v2 = vld [vmem:[#allocation15_spill] sm:$0xff] }
 0x217   :  { %2281 = vtanh.f32 %v729_v5  ;;  %v3515_v5 = vld [vmem:[#allocation19_spill] sm:$0xff] }
 0x224   :  { %v2282_v60 = vpop.eup %2281 }
 0x225   :  { %v732_v61 = vmul.f32 %v2282_v60, %v731_v38 }
 0x227   :  { %v2933_v47 = vadd.f32 %v733_v32, %v732_v61  ;;  %v3516_v61 = vld [vmem:[#allocation20_spill] sm:$0xff] }
 0x229   :  { %736 = vst [vmem:[#allocation6 + $0x8] sm:$0xff] %v2933_v47  ;;  %808 = vmatmul.mubr.f32.vlgmr.msra.gmra.mxu0 %v2933_v47  ;;  %2078 = vmatmul.mubr.f32.vlgmr.msra.gmra.mxu1 %v2933_v47 }
 0x22a   :  { %914 = vmatpush1.msra.mxu0 %v2495_v7  ;;  %2081 = vmatpush3.msra.mxu1 %v2603_v36 }
 0x22b   :  { %915 = vmatprep.subr.mxu0 %v2497_v8  ;;  %2082 = vmatprep.subr.mxu1 %v3495_v62 }
 0x22c   :  { %916 = vmatpush1.msra.mxu0 %v2501_v9  ;;  %2083 = vmatpush3.msra.mxu1 %v2625_v42 }
 0x22d   :  { %917 = vmatprep.subr.mxu0 %v2508_v11  ;;  %2084 = vmatprep.subr.mxu1 %v3495_v62 }
 0x22e   :  { %918 = vmatpush1.msra.mxu0 %v2511_v12  ;;  %2085 = vmatpush3.msra.mxu1 %v2646_v48 }
 0x22f   :  { %919 = vmatprep.subr.mxu0 %v2514_v13  ;;  %2086 = vmatprep.subr.mxu1 %v3495_v62 }
 0x230   :  { %920 = vmatpush1.msra.mxu0 %v2518_v14  ;;  %2087 = vmatpush3.msra.mxu1 %v2654_v50 }
 0x231   :  { %921 = vmatprep.subr.mxu0 %v2527_v16  ;;  %2088 = vmatprep.subr.mxu1 %v3495_v62 }
 0x232   :  { %922 = vmatpush1.msra.mxu0 %v2530_v17  ;;  %2089 = vmatpush3.msra.mxu1 %v2660_v51 }
 0x233   :  { %923 = vmatprep.subr.mxu0 %v2533_v18  ;;  %2090 = vmatprep.subr.mxu1 %v3495_v62 }
 0x234   :  { %924 = vmatpush1.msra.mxu0 %v2538_v19  ;;  %2091 = vmatpush3.msra.mxu1 %v2665_v52 }
 0x235   :  { %925 = vmatprep.subr.mxu0 %v2550_v22  ;;  %2092 = vmatprep.subr.mxu1 %v3495_v62 }
 0x236   :  { %926 = vmatpush1.msra.mxu0 %v2553_v23  ;;  %2093 = vmatpush3.msra.mxu1 %v2672_v53 }
 0x237   :  { %927 = vmatprep.subr.mxu0 %v2556_v24  ;;  %2094 = vmatprep.subr.mxu1 %v3495_v62 }
 0x238   :  { %928 = vmatpush1.msra.mxu0 %v2564_v26  ;;  %2095 = vmatpush3.msra.mxu1 %v2680_v54 }
 0x239   :  { %929 = vmatprep.subr.mxu0 %v2573_v28  ;;  %2096 = vmatprep.subr.mxu1 %v3495_v62 }
 0x23a   :  { %930 = vmatpush1.msra.mxu0 %v2576_v29  ;;  %2097 = vmatpush3.msra.mxu1 %v2686_v55 }
 0x23b   :  { %931 = vmatprep.subr.mxu0 %v2579_v30  ;;  %2098 = vmatprep.subr.mxu1 %v3495_v62 }
 0x23c   :  { %932 = vmatpush1.msra.mxu0 %v2584_v31  ;;  %2099 = vmatpush3.msra.mxu1 %v2693_v56 }
 0x23d   :  { %933 = vmatprep.subr.mxu0 %v2593_v33  ;;  %2100 = vmatprep.subr.mxu1 %v3495_v62 }
 0x23e   :  { %934 = vmatpush1.msra.mxu0 %v2596_v34  ;;  %2101 = vmatpush3.msra.mxu1 %v2699_v57 }
 0x23f   :  { %935 = vmatprep.subr.mxu0 %v2600_v35  ;;  %2102 = vmatprep.subr.mxu1 %v3495_v62 }
 0x240   :  { %936 = vmatpush1.msra.mxu0 %v2608_v37  ;;  %2103 = vmatpush3.msra.mxu1 %v2706_v58 }
 0x241   :  { %937 = vmatprep.subr.mxu0 %v2615_v39  ;;  %2104 = vmatprep.subr.mxu1 %v3495_v62 }
 0x242   :  { %938 = vmatpush1.msra.mxu0 %v2618_v40  ;;  %2105 = vmatpush3.msra.mxu1 %v2712_v59 }
 0x243   :  { %939 = vmatprep.subr.mxu0 %v2622_v41  ;;  %2106 = vmatprep.subr.mxu1 %v3495_v62 }
 0x244   :  { %940 = vmatpush1.msra.mxu0 %v2629_v43  ;;  %2107 = vmatpush3.msra.mxu1 %v3496_v25 }
 0x245   :  { %941 = vmatprep.subr.mxu0 %v3497_v20  ;;  %2108 = vmatprep.subr.mxu1 %v3495_v62 }
 0x246   :  { %942 = vmatpush1.msra.mxu0 %v3508_v0  ;;  %2109 = vmatpush3.msra.mxu1 %v3509_v2 }
 0x247   :  { %943 = vmatprep.subr.mxu0 %v3510_v46  ;;  %2110 = vmatprep.subr.mxu1 %v3495_v62 }
 0x248   :  { %944 = vmatpush1.msra.mxu0 %v3511_v4  ;;  %977 = vmatprep.mubr.f32.mxu0 %v3495_v62 }
 0x249   :  { %2111 = vmatpush3.msra.mxu1 %v3512_v1  ;;  %2112 = vmatprep.mubr.msk.f32.mxu1 %vm2439_vm1, %v3495_v62 }
 0x24a   :  { %1083 = vmatprep.subr.mxu0 %v3513_v45  ;;  %2115 = vmatprep.subr.mxu1 %v3495_v62 }
 0x2e9   :  { %v809_v10 = vpop.f32.mrf.mxu0  ;;  %v880_v21 = vpop.f32.mrf.mxu1 }
 0x2ea   :  { %v810_v44 = vadd.f32 %v809_v10, %v3514_v27  ;;  %v881_v0 = vadd.f32 %v880_v21, %v2851_v3  ;;  %v3134_v21 = vld [vmem:[#allocation3 + $0x110] sm:$0xff] }
 0x2eb   :  { %v811_v63 = vpop.f32.mrf.mxu0  ;;  %v2079_v15 = vpop.f32.mrf.mxu1 }
 0x2ec   :  { %v884_v6 = vadd.f32 %v810_v44, %v3515_v5  ;;  %v812_v60 = vadd.f32 %v811_v63, %v2836_v49  ;;  %v3517_v15 = vld [vmem:[#allocation34_spill] sm:$0xff] }
 0x2ee   :  { %v1801_v38 = vmul.f32 -1.442695, %v884_v6  ;;  %v891_v32 = vadd.f32 %v812_v60, %v3516_v61  ;;  %v3141_v61 = vld [vmem:[#allocation3 + $0x118] sm:$0xff] }
 0x2f0   :  { %2283 = vpow2.f32 %v1801_v38  ;;  %v1802_v1 = vmul.f32 -1.442695, %v891_v32  ;;  %v3144_v32 = vld [vmem:[#allocation3 + $0xf8] sm:$0xff] }
 0x2f2   :  { %2285 = vpow2.f32 %v1802_v1 }
 0x2fd   :  { %v2284_v4 = vpop.eup %2283 }
 0x2fe   :  { %v888_v45 = vadd.f32 1.0, %v2284_v4  ;;  %v3131_v4 = vld [vmem:[#allocation3 + $0x130] sm:$0xff] }
 0x2ff   :  { %v2286_v46 = vpop.eup %2285 }
 0x300   :  { %2287 = vrcp.f32 %v888_v45  ;;  %v895_v2 = vadd.f32 1.0, %v2286_v46  ;;  %v3128_v46 = vld [vmem:[#allocation3 + $0x120] sm:$0xff]  ;;  %v3148_v45 = vld [vmem:[#allocation3 + $0xf0] sm:$0xff] }
 0x302   :  { %2289 = vrcp.f32 %v895_v2  ;;  %v3124_v2 = vld [vmem:[#allocation3 + $0x128] sm:$0xff] }
 0x30d   :  { %v2288_v10 = vpop.eup %2287 }
 0x30e   :  { %v898_v27 = vmul.f32 %v2288_v10, %v881_v0  ;;  %v3121_v0 = vld [vmem:[#allocation3 + $0x148] sm:$0xff]  ;;  %v3151_v10 = vld [vmem:[#allocation3 + $0x100] sm:$0xff] }
 0x30f   :  { %v2290_v5 = vpop.eup %2289 }
 0x310   :  { %v899_v44 = vadd.f32 %v898_v27, %v3517_v15  ;;  %v901_v63 = vsub.f32 1.0, %v2290_v5  ;;  %v903_v60 = vmul.f32 %v2290_v5, %v2933_v47  ;;  %v3118_v47 = vld [vmem:[#allocation3 + $0x138] sm:$0xff]  ;;  %v3138_v27 = vld [vmem:[#allocation3 + $0x108] sm:$0xff]  ;;  %v3154_v15 = vld [vmem:[#allocation3 + $0xe0] sm:$0xff] }
 0x311   :  { %v3161_v5 = vld [vmem:[#allocation3 + $0xe8] sm:$0xff] }
 0x312   :  { %2291 = vtanh.f32 %v899_v44  ;;  %v3158_v44 = vld [vmem:[#allocation3 + $0xd8] sm:$0xff] }
 0x31f   :  { %v2292_v6 = vpop.eup %2291 }
 0x320   :  { %v902_v38 = vmul.f32 %v2292_v6, %v901_v63  ;;  %v3164_v63 = vld [vmem:[#allocation3 + $0xc8] sm:$0xff]  ;;  %v3168_v6 = vld [vmem:[#allocation3 + $0xc0] sm:$0xff] }
 0x322   :  { %v3012_v1 = vadd.f32 %v903_v60, %v902_v38  ;;  %v3171_v38 = vld [vmem:[#allocation3 + $0xd0] sm:$0xff] }
 0x323   :  { %v3174_v60 = vld [vmem:[#allocation3 + $0xb0] sm:$0xff] }
 0x324   :  { %906 = vst [vmem:[#allocation6 + $0x10] sm:$0xff] %v3012_v1  ;;  %978 = vmatmul.mubr.f32.vlgmr.msra.gmra.mxu0 %v3012_v1  ;;  %2113 = vmatmul.mubr.f32.vlgmr.msra.gmra.mxu1 %v3012_v1 }
 0x325   :  { %1084 = vmatpush1.msra.mxu0 %v2495_v7  ;;  %2116 = vmatpush3.msra.mxu1 %v2603_v36  ;;  %v3518_v7 = vld [vmem:[#allocation11_spill] sm:$0xff] }
 0x326   :  { %1085 = vmatprep.subr.mxu0 %v2497_v8  ;;  %2117 = vmatprep.subr.mxu1 %v3495_v62  ;;  %v3519_v8 = vld [vmem:[#allocation15_spill] sm:$0xff] }
 0x327   :  { %1086 = vmatpush1.msra.mxu0 %v2501_v9  ;;  %2118 = vmatpush3.msra.mxu1 %v2625_v42  ;;  %v3520_v9 = vld [vmem:[#allocation12_spill] sm:$0xff] }
 0x328   :  { %1087 = vmatprep.subr.mxu0 %v2508_v11  ;;  %2119 = vmatprep.subr.mxu1 %v3495_v62  ;;  %v3521_v11 = vld [vmem:[#allocation13_spill] sm:$0xff] }
 0x329   :  { %1088 = vmatpush1.msra.mxu0 %v2511_v12  ;;  %2120 = vmatpush3.msra.mxu1 %v2646_v48  ;;  %v3522_v12 = vld [vmem:[#allocation16_spill] sm:$0xff] }
 0x32a   :  { %1089 = vmatprep.subr.mxu0 %v2514_v13  ;;  %2121 = vmatprep.subr.mxu1 %v3495_v62  ;;  %v3082_v13 = vld [vmem:[#allocation3 + $0x170] sm:$0xff] }
 0x32b   :  { %1090 = vmatpush1.msra.mxu0 %v2518_v14  ;;  %2122 = vmatpush3.msra.mxu1 %v2654_v50  ;;  %3523 = vst [vmem:[#allocation14_spill] sm:$0xff] %v3082_v13 }
 0x32c   :  { %1091 = vmatprep.subr.mxu0 %v2527_v16  ;;  %2123 = vmatprep.subr.mxu1 %v3495_v62 }
 0x32d   :  { %1092 = vmatpush1.msra.mxu0 %v2530_v17  ;;  %2124 = vmatpush3.msra.mxu1 %v2660_v51  ;;  %v3524_v17 = vld [vmem:[#allocation31_spill] sm:$0xff] }
 0x32e   :  { %1093 = vmatprep.subr.mxu0 %v2533_v18  ;;  %2125 = vmatprep.subr.mxu1 %v3495_v62 }
 0x32f   :  { %1094 = vmatpush1.msra.mxu0 %v2538_v19  ;;  %2126 = vmatpush3.msra.mxu1 %v2665_v52 }
 0x330   :  { %1095 = vmatprep.subr.mxu0 %v2550_v22  ;;  %2127 = vmatprep.subr.mxu1 %v3495_v62 }
 0x331   :  { %1096 = vmatpush1.msra.mxu0 %v2553_v23  ;;  %2128 = vmatpush3.msra.mxu1 %v2672_v53  ;;  %v3525_v23 = vld [vmem:[#allocation21_spill] sm:$0xff] }
 0x332   :  { %1097 = vmatprep.subr.mxu0 %v2556_v24  ;;  %2129 = vmatprep.subr.mxu1 %v3495_v62 }
 0x333   :  { %1098 = vmatpush1.msra.mxu0 %v2564_v26  ;;  %2130 = vmatpush3.msra.mxu1 %v2680_v54  ;;  %v3098_v54 = vld [vmem:[#allocation3 + $0x168] sm:$0xff] }
 0x334   :  { %1099 = vmatprep.subr.mxu0 %v2573_v28  ;;  %2131 = vmatprep.subr.mxu1 %v3495_v62 }
 0x335   :  { %1100 = vmatpush1.msra.mxu0 %v2576_v29  ;;  %2132 = vmatpush3.msra.mxu1 %v2686_v55  ;;  %v3526_v29 = vld [vmem:[#allocation22_spill] sm:$0xff]  ;;  %v3101_v55 = vld [vmem:[#allocation3 + $0x178] sm:$0xff] }
 0x336   :  { %1101 = vmatprep.subr.mxu0 %v2579_v30  ;;  %2133 = vmatprep.subr.mxu1 %v3495_v62 }
 0x337   :  { %1102 = vmatpush1.msra.mxu0 %v2584_v31  ;;  %2134 = vmatpush3.msra.mxu1 %v2693_v56  ;;  %v3104_v56 = vld [vmem:[#allocation3 + $0x158] sm:$0xff] }
 0x338   :  { %1103 = vmatprep.subr.mxu0 %v2593_v33  ;;  %2135 = vmatprep.subr.mxu1 %v3495_v62 }
 0x339   :  { %1104 = vmatpush1.msra.mxu0 %v2596_v34  ;;  %2136 = vmatpush3.msra.mxu1 %v2699_v57  ;;  %v3108_v57 = vld [vmem:[#allocation3 + $0x150] sm:$0xff] }
 0x33a   :  { %1105 = vmatprep.subr.mxu0 %v2600_v35  ;;  %2137 = vmatprep.subr.mxu1 %v3495_v62 }
 0x33b   :  { %1106 = vmatpush1.msra.mxu0 %v2608_v37  ;;  %2138 = vmatpush3.msra.mxu1 %v2706_v58  ;;  %v3111_v58 = vld [vmem:[#allocation3 + $0x160] sm:$0xff] }
 0x33c   :  { %1107 = vmatprep.subr.mxu0 %v2615_v39  ;;  %2139 = vmatprep.subr.mxu1 %v3495_v62 }
 0x33d   :  { %1108 = vmatpush1.msra.mxu0 %v2618_v40  ;;  %2140 = vmatpush3.msra.mxu1 %v2712_v59 }
 0x33e   :  { %1109 = vmatprep.subr.mxu0 %v2622_v41  ;;  %2141 = vmatprep.subr.mxu1 %v3495_v62  ;;  %v3527_v41 = vld [vmem:[#allocation33_spill] sm:$0xff] }
 0x33f   :  { %1110 = vmatpush1.msra.mxu0 %v2629_v43  ;;  %2142 = vmatpush3.msra.mxu1 %v3496_v25 }
 0x340   :  { %1111 = vmatprep.subr.mxu0 %v3497_v20  ;;  %2143 = vmatprep.subr.mxu1 %v3495_v62  ;;  %v3114_v20 = vld [vmem:[#allocation3 + $0x140] sm:$0xff] }
 0x341   :  { %1112 = vmatpush1.msra.mxu0 %v3518_v7  ;;  %2144 = vmatpush3.msra.mxu1 %v3519_v8  ;;  %v3181_v7 = vld [vmem:[#allocation3 + $0xb8] sm:$0xff] }
 0x342   :  { %1113 = vmatprep.subr.mxu0 %v3520_v9  ;;  %2145 = vmatprep.subr.mxu1 %v3495_v62  ;;  %v3184_v9 = vld [vmem:[#allocation3 + $0x98] sm:$0xff] }
 0x343   :  { %1114 = vmatpush1.msra.mxu0 %v3521_v11  ;;  %1147 = vmatprep.mubr.f32.mxu0 %v3495_v62  ;;  %v3188_v11 = vld [vmem:[#allocation3 + $0x90] sm:$0xff] }
 0x344   :  { %2146 = vmatpush3.msra.mxu1 %v3522_v12  ;;  %2147 = vmatprep.mubr.msk.f32.mxu1 %vm2439_vm1, %v3495_v62 }
 0x345   :  { %1253 = vmatprep.subr.mxu0 %v3082_v13  ;;  %2150 = vmatprep.subr.mxu1 %v3495_v62 }
 0x3e4   :  { %v979_v14 = vpop.f32.mrf.mxu0  ;;  %v1050_v16 = vpop.f32.mrf.mxu1 }
 0x3e5   :  { %v980_v18 = vadd.f32 %v979_v14, %v3524_v17  ;;  %v1051_v37 = vadd.f32 %v1050_v16, %v2851_v3  ;;  %v3191_v14 = vld [vmem:[#allocation3 + $0xa0] sm:$0xff] }
 0x3e6   :  { %v981_v19 = vpop.f32.mrf.mxu0  ;;  %v2114_v22 = vpop.f32.mrf.mxu1  ;;  %v3194_v16 = vld [vmem:[#allocation3 + $0x80] sm:$0xff] }
 0x3e7   :  { %v1054_v24 = vadd.f32 %v980_v18, %v3525_v23  ;;  %v982_v28 = vadd.f32 %v981_v19, %v2836_v49  ;;  %v3198_v18 = vld [vmem:[#allocation3 + $0x78] sm:$0xff]  ;;  %v3201_v19 = vld [vmem:[#allocation3 + $0x88] sm:$0xff]  ;;  %v3208_v23 = vld [vmem:[#allocation3 + $0x60] sm:$0xff] }
 0x3e8   :  { %v3204_v22 = vld [vmem:[#allocation3 + $0x68] sm:$0xff] }
 0x3e9   :  { %v1803_v26 = vmul.f32 -1.442695, %v1054_v24  ;;  %v1061_v30 = vadd.f32 %v982_v28, %v3526_v29  ;;  %v3211_v24 = vld [vmem:[#allocation3 + $0x70] sm:$0xff]  ;;  %v3218_v28 = vld [vmem:[#allocation3 + $0x48] sm:$0xff]  ;;  %v3222_v29 = vld [vmem:[#allocation3 + $0x38] sm:$0xff] }
 0x3eb   :  { %2293 = vpow2.f32 %v1803_v26  ;;  %v1804_v31 = vmul.f32 -1.442695, %v1061_v30  ;;  %v3214_v26 = vld [vmem:[#allocation3 + $0x50] sm:$0xff] }
 0x3ec   :  { %v3226_v30 = vld [vmem:[#allocation3 + $0x30] sm:$0xff] }
 0x3ed   :  { %2295 = vpow2.f32 %v1804_v31  ;;  %v3230_v31 = vld [vmem:[#allocation3 + $0x20] sm:$0xff] }
 0x3f8   :  { %v2294_v33 = vpop.eup %2293 }
 0x3f9   :  { %v1058_v34 = vadd.f32 1.0, %v2294_v33  ;;  %v3234_v33 = vld [vmem:[#allocation3 + $0x18] sm:$0xff] }
 0x3fa   :  { %v2296_v35 = vpop.eup %2295  ;;  %3528 = vst [vmem:[#allocation10_spill] sm:$0xff] %v3234_v33 }
 0x3fb   :  { %2297 = vrcp.f32 %v1058_v34  ;;  %v1065_v36 = vadd.f32 1.0, %v2296_v35  ;;  %v3242_v34 = vld [vmem:[#allocation3] sm:$0xff] }
 0x3fc   :  { %3530 = vst [vmem:[#allocation18_spill] sm:$0xff] %v3242_v34 }
 0x3fd   :  { %2299 = vrcp.f32 %v1065_v36 }
 0x408   :  { %v2298_v39 = vpop.eup %2297 }
 0x409   :  { %v1068_v40 = vmul.f32 %v2298_v39, %v1051_v37  ;;  %v3531_v39 = vld [vmem:[#allocation23_spill] sm:$0xff] }
 0x40a   :  { %v2300_v43 = vpop.eup %2299 }
 0x40b   :  { %v1069_v42 = vadd.f32 %v1068_v40, %v3527_v41  ;;  %v1071_v48 = vsub.f32 1.0, %v2300_v43  ;;  %v1073_v52 = vmul.f32 %v2300_v43, %v3012_v1  ;;  %v3178_v1 = vld [vmem:[#allocation3 + $0xa8] sm:$0xff] }
 0x40d   :  { %2301 = vtanh.f32 %v1069_v42 }
 0x41a   :  { %v2302_v50 = vpop.eup %2301 }
 0x41b   :  { %v1072_v51 = vmul.f32 %v2302_v50, %v1071_v48 }
 0x41d   :  { %v3093_v53 = vadd.f32 %v1073_v52, %v1072_v51 }
 0x41f   :  { %1076 = vst [vmem:[#allocation6 + $0x18] sm:$0xff] %v3093_v53  ;;  %1148 = vmatmul.mubr.f32.vlgmr.msra.gmra.mxu0 %v3093_v53  ;;  %2148 = vmatmul.mubr.f32.vlgmr.msra.gmra.mxu1 %v3093_v53 }
 0x420   :  { %1254 = vmatpush1.msra.mxu0 %v3098_v54  ;;  %2151 = vmatpush3.msra.mxu1 %v3101_v55 }
 0x421   :  { %1255 = vmatprep.subr.mxu0 %v3104_v56  ;;  %2152 = vmatprep.subr.mxu1 %v3495_v62 }
 0x422   :  { %1256 = vmatpush1.msra.mxu0 %v3108_v57  ;;  %2153 = vmatpush3.msra.mxu1 %v3111_v58 }
 0x423   :  { %1257 = vmatprep.subr.mxu0 %v3114_v20  ;;  %2154 = vmatprep.subr.mxu1 %v3495_v62 }
 0x424   :  { %1258 = vmatpush1.msra.mxu0 %v3118_v47  ;;  %2155 = vmatpush3.msra.mxu1 %v3121_v0 }
 0x425   :  { %1259 = vmatprep.subr.mxu0 %v3124_v2  ;;  %2156 = vmatprep.subr.mxu1 %v3495_v62 }
 0x426   :  { %1260 = vmatpush1.msra.mxu0 %v3128_v46  ;;  %2157 = vmatpush3.msra.mxu1 %v3131_v4 }
 0x427   :  { %1261 = vmatprep.subr.mxu0 %v3134_v21  ;;  %2158 = vmatprep.subr.mxu1 %v3495_v62 }
 0x428   :  { %1262 = vmatpush1.msra.mxu0 %v3138_v27  ;;  %2159 = vmatpush3.msra.mxu1 %v3141_v61 }
 0x429   :  { %1263 = vmatprep.subr.mxu0 %v3144_v32  ;;  %2160 = vmatprep.subr.mxu1 %v3495_v62 }
 0x42a   :  { %1264 = vmatpush1.msra.mxu0 %v3148_v45  ;;  %2161 = vmatpush3.msra.mxu1 %v3151_v10 }
 0x42b   :  { %1265 = vmatprep.subr.mxu0 %v3154_v15  ;;  %2162 = vmatprep.subr.mxu1 %v3495_v62 }
 0x42c   :  { %1266 = vmatpush1.msra.mxu0 %v3158_v44  ;;  %2163 = vmatpush3.msra.mxu1 %v3161_v5 }
 0x42d   :  { %1267 = vmatprep.subr.mxu0 %v3164_v63  ;;  %2164 = vmatprep.subr.mxu1 %v3495_v62 }
 0x42e   :  { %1268 = vmatpush1.msra.mxu0 %v3168_v6  ;;  %2165 = vmatpush3.msra.mxu1 %v3171_v38 }
 0x42f   :  { %1269 = vmatprep.subr.mxu0 %v3174_v60  ;;  %2166 = vmatprep.subr.mxu1 %v3495_v62 }
 0x430   :  { %1270 = vmatpush1.msra.mxu0 %v3178_v1  ;;  %2167 = vmatpush3.msra.mxu1 %v3181_v7 }
 0x431   :  { %1271 = vmatprep.subr.mxu0 %v3184_v9  ;;  %2168 = vmatprep.subr.mxu1 %v3495_v62 }
 0x432   :  { %1272 = vmatpush1.msra.mxu0 %v3188_v11  ;;  %2169 = vmatpush3.msra.mxu1 %v3191_v14 }
 0x433   :  { %1273 = vmatprep.subr.mxu0 %v3194_v16  ;;  %2170 = vmatprep.subr.mxu1 %v3495_v62 }
 0x434   :  { %1274 = vmatpush1.msra.mxu0 %v3198_v18  ;;  %2171 = vmatpush3.msra.mxu1 %v3201_v19 }
 0x435   :  { %1275 = vmatprep.subr.mxu0 %v3204_v22  ;;  %2172 = vmatprep.subr.mxu1 %v3495_v62 }
 0x436   :  { %1276 = vmatpush1.msra.mxu0 %v3208_v23  ;;  %2173 = vmatpush3.msra.mxu1 %v3211_v24 }
 0x437   :  { %1277 = vmatprep.subr.mxu0 %v3214_v26  ;;  %2174 = vmatprep.subr.mxu1 %v3495_v62 }
 0x438   :  { %1278 = vmatpush1.msra.mxu0 %v3218_v28  ;;  %2175 = vmatpush3.msra.mxu1 %v2712_v59  ;;  %v3238_v59 = vld [vmem:[#allocation3 + $0x8] sm:$0xff] }
 0x439   :  { %1279 = vmatprep.subr.mxu0 %v3222_v29  ;;  %2176 = vmatprep.subr.mxu1 %v3495_v62  ;;  %3529 = vst [vmem:[#allocation17_spill] sm:$0xff] %v3238_v59 }
 0x43a   :  { %1280 = vmatpush1.msra.mxu0 %v3226_v30  ;;  %2177 = vmatpush3.msra.mxu1 %v3496_v25 }
 0x43b   :  { %1281 = vmatprep.subr.mxu0 %v3230_v31  ;;  %2178 = vmatprep.subr.mxu1 %v3495_v62 }
 0x43c   :  { %1282 = vmatpush1.msra.mxu0 %v3234_v33  ;;  %2179 = vmatpush3.msra.mxu1 %v3519_v8 }
 0x43d   :  { %1283 = vmatprep.subr.mxu0 %v3238_v59  ;;  %2180 = vmatprep.subr.mxu1 %v3495_v62 }
 0x43e   :  { %1284 = vmatpush1.msra.mxu0 %v3242_v34  ;;  %1317 = vmatprep.mubr.f32.mxu0 %v3495_v62 }
 0x43f   :  { %2181 = vmatpush3.msra.mxu1 %v3522_v12  ;;  %2182 = vmatprep.mubr.msk.f32.mxu1 %vm2439_vm1, %v3495_v62  ;;  %v3532_v12 = vld [vmem:[#allocation24_spill] sm:$0xff] }
 0x440   :  { %1423 = vmatprep.subr.mxu0 %v3082_v13  ;;  %2185 = vmatprep.subr.mxu1 %v3495_v62 }
 0x4df   :  { %v1149_v25 = vpop.f32.mrf.mxu0  ;;  %v1220_v8 = vpop.f32.mrf.mxu1 }
 0x4e0   :  { %v1150_v35 = vadd.f32 %v1149_v25, %v3524_v17  ;;  %v1221_v34 = vadd.f32 %v1220_v8, %v2851_v3  ;;  %v3331_v8 = vld [vmem:[#allocation3 + $0x10] sm:$0xff] }
 0x4e1   :  { %v1151_v36 = vpop.f32.mrf.mxu0  ;;  %v2149_v37 = vpop.f32.mrf.mxu1  ;;  %3536 = vst [vmem:[#allocation9_spill] sm:$0xff] %v3331_v8 }
 0x4e2   :  { %v1224_v40 = vadd.f32 %v1150_v35, %v3531_v39  ;;  %v1152_v42 = vadd.f32 %v1151_v36, %v2836_v49  ;;  %v3533_v37 = vld [vmem:[#allocation36_spill] sm:$0xff] }
 0x4e4   :  { %v1805_v41 = vmul.f32 -1.442695, %v1224_v40  ;;  %v1231_v43 = vadd.f32 %v1152_v42, %v3532_v12 }
 0x4e6   :  { %2303 = vpow2.f32 %v1805_v41  ;;  %v1806_v48 = vmul.f32 -1.442695, %v1231_v43  ;;  %v3537_v43 = vld [vmem:[#allocation14_spill] sm:$0xff] }
 0x4e8   :  { %2305 = vpow2.f32 %v1806_v48 }
 0x4f3   :  { %v2304_v50 = vpop.eup %2303 }
 0x4f4   :  { %v1228_v51 = vadd.f32 1.0, %v2304_v50 }
 0x4f5   :  { %v2306_v52 = vpop.eup %2305 }
 0x4f6   :  { %2307 = vrcp.f32 %v1228_v51  ;;  %v1235_v13 = vadd.f32 1.0, %v2306_v52  ;;  %v3538_v51 = vld [vmem:[#allocation31_spill] sm:$0xff] }
 0x4f8   :  { %2309 = vrcp.f32 %v1235_v13  ;;  %v3312_v13 = vld [vmem:[#allocation3 + $0x58] sm:$0xff] }
 0x503   :  { %v2308_v25 = vpop.eup %2307 }
 0x504   :  { %v1238_v17 = vmul.f32 %v2308_v25, %v1221_v34  ;;  %v3535_v34 = vld [vmem:[#allocation18_spill] sm:$0xff] }
 0x505   :  { %v2310_v39 = vpop.eup %2309 }
 0x506   :  { %v1239_v35 = vadd.f32 %v1238_v17, %v3533_v37  ;;  %v1241_v36 = vsub.f32 1.0, %v2310_v39  ;;  %v1243_v42 = vmul.f32 %v2310_v39, %v3093_v53  ;;  %v3318_v17 = vld [vmem:[#allocation3 + $0x40] sm:$0xff]  ;;  %v3324_v53 = vld [vmem:[#allocation3 + $0x28] sm:$0xff] }
 0x507   :  { %3534 = vst [vmem:[#allocation25_spill] sm:$0xff] %v3324_v53 }
 0x508   :  { %2311 = vtanh.f32 %v1239_v35  ;;  %v3539_v35 = vld [vmem:[#allocation26_spill] sm:$0xff] }
 0x515   :  { %v2312_v40 = vpop.eup %2311 }
 0x516   :  { %v1242_v41 = vmul.f32 %v2312_v40, %v1241_v36 }
 0x518   :  { %v3258_v12 = vadd.f32 %v1243_v42, %v1242_v41  ;;  %v3540_v41 = vld [vmem:[#allocation27_spill] sm:$0xff] }
 0x51a   :  { %1246 = vst [vmem:[#allocation6 + $0x20] sm:$0xff] %v3258_v12  ;;  %1318 = vmatmul.mubr.f32.vlgmr.msra.gmra.mxu0 %v3258_v12  ;;  %2183 = vmatmul.mubr.f32.vlgmr.msra.gmra.mxu1 %v3258_v12 }
 0x51b   :  { %1424 = vmatpush1.msra.mxu0 %v3098_v54  ;;  %2186 = vmatpush3.msra.mxu1 %v3101_v55 }
 0x51c   :  { %1425 = vmatprep.subr.mxu0 %v3104_v56  ;;  %2187 = vmatprep.subr.mxu1 %v3495_v62 }
 0x51d   :  { %1426 = vmatpush1.msra.mxu0 %v3108_v57  ;;  %2188 = vmatpush3.msra.mxu1 %v3111_v58 }
 0x51e   :  { %1427 = vmatprep.subr.mxu0 %v3114_v20  ;;  %2189 = vmatprep.subr.mxu1 %v3495_v62 }
 0x51f   :  { %1428 = vmatpush1.msra.mxu0 %v3118_v47  ;;  %2190 = vmatpush3.msra.mxu1 %v3121_v0 }
 0x520   :  { %1429 = vmatprep.subr.mxu0 %v3124_v2  ;;  %2191 = vmatprep.subr.mxu1 %v3495_v62 }
 0x521   :  { %1430 = vmatpush1.msra.mxu0 %v3128_v46  ;;  %2192 = vmatpush3.msra.mxu1 %v3131_v4 }
 0x522   :  { %1431 = vmatprep.subr.mxu0 %v3134_v21  ;;  %2193 = vmatprep.subr.mxu1 %v3495_v62 }
 0x523   :  { %1432 = vmatpush1.msra.mxu0 %v3138_v27  ;;  %2194 = vmatpush3.msra.mxu1 %v3141_v61 }
 0x524   :  { %1433 = vmatprep.subr.mxu0 %v3144_v32  ;;  %2195 = vmatprep.subr.mxu1 %v3495_v62 }
 0x525   :  { %1434 = vmatpush1.msra.mxu0 %v3148_v45  ;;  %2196 = vmatpush3.msra.mxu1 %v3151_v10 }
 0x526   :  { %1435 = vmatprep.subr.mxu0 %v3154_v15  ;;  %2197 = vmatprep.subr.mxu1 %v3495_v62 }
 0x527   :  { %1436 = vmatpush1.msra.mxu0 %v3158_v44  ;;  %2198 = vmatpush3.msra.mxu1 %v3161_v5 }
 0x528   :  { %1437 = vmatprep.subr.mxu0 %v3164_v63  ;;  %2199 = vmatprep.subr.mxu1 %v3495_v62 }
 0x529   :  { %1438 = vmatpush1.msra.mxu0 %v3168_v6  ;;  %2200 = vmatpush3.msra.mxu1 %v3171_v38 }
 0x52a   :  { %1439 = vmatprep.subr.mxu0 %v3174_v60  ;;  %2201 = vmatprep.subr.mxu1 %v3495_v62 }
 0x52b   :  { %1440 = vmatpush1.msra.mxu0 %v3178_v1  ;;  %2202 = vmatpush3.msra.mxu1 %v3181_v7 }
 0x52c   :  { %1441 = vmatprep.subr.mxu0 %v3184_v9  ;;  %2203 = vmatprep.subr.mxu1 %v3495_v62 }
 0x52d   :  { %1442 = vmatpush1.msra.mxu0 %v3188_v11  ;;  %2204 = vmatpush3.msra.mxu1 %v3191_v14 }
 0x52e   :  { %1443 = vmatprep.subr.mxu0 %v3194_v16  ;;  %2205 = vmatprep.subr.mxu1 %v3495_v62 }
 0x52f   :  { %1444 = vmatpush1.msra.mxu0 %v3198_v18  ;;  %2206 = vmatpush3.msra.mxu1 %v3201_v19 }
 0x530   :  { %1445 = vmatprep.subr.mxu0 %v3204_v22  ;;  %2207 = vmatprep.subr.mxu1 %v3495_v62 }
 0x531   :  { %1446 = vmatpush1.msra.mxu0 %v3208_v23  ;;  %2208 = vmatpush3.msra.mxu1 %v3211_v24 }
 0x532   :  { %1447 = vmatprep.subr.mxu0 %v3214_v26  ;;  %2209 = vmatprep.subr.mxu1 %v3495_v62 }
 0x533   :  { %1448 = vmatpush1.msra.mxu0 %v3218_v28  ;;  %2210 = vmatpush3.msra.mxu1 %v3312_v13 }
 0x534   :  { %1449 = vmatprep.subr.mxu0 %v3222_v29  ;;  %2211 = vmatprep.subr.mxu1 %v3495_v62 }
 0x535   :  { %1450 = vmatpush1.msra.mxu0 %v3226_v30  ;;  %2212 = vmatpush3.msra.mxu1 %v3318_v17 }
 0x536   :  { %1451 = vmatprep.subr.mxu0 %v3230_v31  ;;  %2213 = vmatprep.subr.mxu1 %v3495_v62 }
 0x537   :  { %1452 = vmatpush1.msra.mxu0 %v3234_v33  ;;  %2214 = vmatpush3.msra.mxu1 %v3324_v53 }
 0x538   :  { %1453 = vmatprep.subr.mxu0 %v3238_v59  ;;  %2215 = vmatprep.subr.mxu1 %v3495_v62 }
 0x539   :  { %1454 = vmatpush1.msra.mxu0 %v3535_v34  ;;  %1487 = vmatprep.mubr.f32.mxu0 %v3495_v62 }
 0x53a   :  { %2216 = vmatpush3.msra.mxu1 %v3331_v8  ;;  %2217 = vmatprep.mubr.msk.f32.mxu1 %vm2439_vm1, %v3495_v62 }
 0x53b   :  { %1593 = vmatprep.subr.mxu0 %v3537_v43  ;;  %2220 = vmatprep.subr.mxu1 %v3495_v62 }
 0x5da   :  { %v1319_v48 = vpop.f32.mrf.mxu0  ;;  %v1390_v50 = vpop.f32.mrf.mxu1 }
 0x5db   :  { %v1320_v52 = vadd.f32 %v1319_v48, %v3538_v51  ;;  %v1391_v33 = vadd.f32 %v1390_v50, %v2851_v3 }
 0x5dc   :  { %v1321_v25 = vpop.f32.mrf.mxu0  ;;  %v2184_v37 = vpop.f32.mrf.mxu1 }
 0x5dd   :  { %v1394_v39 = vadd.f32 %v1320_v52, %v3539_v35  ;;  %v1322_v40 = vadd.f32 %v1321_v25, %v2836_v49  ;;  %v3541_v37 = vld [vmem:[#allocation35_spill] sm:$0xff] }
 0x5df   :  { %v1807_v36 = vmul.f32 -1.442695, %v1394_v39  ;;  %v1401_v42 = vadd.f32 %v1322_v40, %v3540_v41 }
 0x5e1   :  { %2313 = vpow2.f32 %v1807_v36  ;;  %v1808_v8 = vmul.f32 -1.442695, %v1401_v42 }
 0x5e3   :  { %2315 = vpow2.f32 %v1808_v8 }
 0x5ee   :  { %v2314_v34 = vpop.eup %2313 }
 0x5ef   :  { %v1398_v43 = vadd.f32 1.0, %v2314_v34 }
 0x5f0   :  { %v2316_v59 = vpop.eup %2315 }
 0x5f1   :  { %2317 = vrcp.f32 %v1398_v43  ;;  %v1405_v53 = vadd.f32 1.0, %v2316_v59  ;;  %v3552_v59 = vld [vmem:[#allocation32_spill] sm:$0xff]  ;;  %v3553_v43 = vld [vmem:[#allocation37_spill] sm:$0xff] }
 0x5f3   :  { %2319 = vrcp.f32 %v1405_v53 }
 0x5fe   :  { %v2318_v48 = vpop.eup %2317 }
 0x5ff   :  { %v1408_v51 = vmul.f32 %v2318_v48, %v1391_v33 }
 0x600   :  { %v2320_v35 = vpop.eup %2319 }
 0x601   :  { %v1409_v52 = vadd.f32 %v1408_v51, %v3541_v37  ;;  %v1411_v25 = vsub.f32 1.0, %v2320_v35  ;;  %v1413_v40 = vmul.f32 %v2320_v35, %v3258_v12 }
 0x603   :  { %2321 = vtanh.f32 %v1409_v52 }
 0x610   :  { %v2322_v39 = vpop.eup %2321 }
 0x611   :  { %v1412_v36 = vmul.f32 %v2322_v39, %v1411_v25 }
 0x613   :  { %v3345_v8 = vadd.f32 %v1413_v40, %v1412_v36 }
 0x615   :  { %1416 = vst [vmem:[#allocation6 + $0x28] sm:$0xff] %v3345_v8  ;;  %1488 = vmatmul.mubr.f32.vlgmr.msra.gmra.mxu0 %v3345_v8  ;;  %2218 = vmatmul.mubr.f32.vlgmr.msra.gmra.mxu1 %v3345_v8 }
 0x616   :  { %1594 = vmatpush1.msra.mxu0 %v3098_v54  ;;  %2221 = vmatpush3.msra.mxu1 %v3101_v55  ;;  %v3542_v54 = vld [vmem:[#allocation10_spill] sm:$0xff]  ;;  %v3543_v55 = vld [vmem:[#allocation25_spill] sm:$0xff] }
 0x617   :  { %1595 = vmatprep.subr.mxu0 %v3104_v56  ;;  %2222 = vmatprep.subr.mxu1 %v3495_v62  ;;  %v3544_v56 = vld [vmem:[#allocation17_spill] sm:$0xff] }
 0x618   :  { %1596 = vmatpush1.msra.mxu0 %v3108_v57  ;;  %2223 = vmatpush3.msra.mxu1 %v3111_v58  ;;  %v3545_v57 = vld [vmem:[#allocation18_spill] sm:$0xff]  ;;  %v3546_v58 = vld [vmem:[#allocation9_spill] sm:$0xff] }
 0x619   :  { %1597 = vmatprep.subr.mxu0 %v3114_v20  ;;  %2224 = vmatprep.subr.mxu1 %v3495_v62 }
 0x61a   :  { %1598 = vmatpush1.msra.mxu0 %v3118_v47  ;;  %2225 = vmatpush3.msra.mxu1 %v3121_v0  ;;  %v3547_v0 = vld [vmem:[#allocation31_spill] sm:$0xff] }
 0x61b   :  { %1599 = vmatprep.subr.mxu0 %v3124_v2  ;;  %2226 = vmatprep.subr.mxu1 %v3495_v62 }
 0x61c   :  { %1600 = vmatpush1.msra.mxu0 %v3128_v46  ;;  %2227 = vmatpush3.msra.mxu1 %v3131_v4 }
 0x61d   :  { %1601 = vmatprep.subr.mxu0 %v3134_v21  ;;  %2228 = vmatprep.subr.mxu1 %v3495_v62  ;;  %v3548_v21 = vld [vmem:[#allocation28_spill] sm:$0xff] }
 0x61e   :  { %1602 = vmatpush1.msra.mxu0 %v3138_v27  ;;  %2229 = vmatpush3.msra.mxu1 %v3141_v61 }
 0x61f   :  { %1603 = vmatprep.subr.mxu0 %v3144_v32  ;;  %2230 = vmatprep.subr.mxu1 %v3495_v62 }
 0x620   :  { %1604 = vmatpush1.msra.mxu0 %v3148_v45  ;;  %2231 = vmatpush3.msra.mxu1 %v3151_v10  ;;  %v3549_v45 = vld [vmem:[#allocation29_spill] sm:$0xff] }
 0x621   :  { %1605 = vmatprep.subr.mxu0 %v3154_v15  ;;  %2232 = vmatprep.subr.mxu1 %v3495_v62 }
 0x622   :  { %1606 = vmatpush1.msra.mxu0 %v3158_v44  ;;  %2233 = vmatpush3.msra.mxu1 %v3161_v5 }
 0x623   :  { %1607 = vmatprep.subr.mxu0 %v3164_v63  ;;  %2234 = vmatprep.subr.mxu1 %v3495_v62 }
 0x624   :  { %1608 = vmatpush1.msra.mxu0 %v3168_v6  ;;  %2235 = vmatpush3.msra.mxu1 %v3171_v38 }
 0x625   :  { %1609 = vmatprep.subr.mxu0 %v3174_v60  ;;  %2236 = vmatprep.subr.mxu1 %v3495_v62 }
 0x626   :  { %1610 = vmatpush1.msra.mxu0 %v3178_v1  ;;  %2237 = vmatpush3.msra.mxu1 %v3181_v7  ;;  %v3550_v1 = vld [vmem:[#allocation38_spill] sm:$0xff] }
 0x627   :  { %1611 = vmatprep.subr.mxu0 %v3184_v9  ;;  %2238 = vmatprep.subr.mxu1 %v3495_v62 }
 0x628   :  { %1612 = vmatpush1.msra.mxu0 %v3188_v11  ;;  %2239 = vmatpush3.msra.mxu1 %v3191_v14 }
 0x629   :  { %1613 = vmatprep.subr.mxu0 %v3194_v16  ;;  %2240 = vmatprep.subr.mxu1 %v3495_v62 }
 0x62a   :  { %1614 = vmatpush1.msra.mxu0 %v3198_v18  ;;  %2241 = vmatpush3.msra.mxu1 %v3201_v19 }
 0x62b   :  { %1615 = vmatprep.subr.mxu0 %v3204_v22  ;;  %2242 = vmatprep.subr.mxu1 %v3495_v62 }
 0x62c   :  { %1616 = vmatpush1.msra.mxu0 %v3208_v23  ;;  %2243 = vmatpush3.msra.mxu1 %v3211_v24 }
 0x62d   :  { %1617 = vmatprep.subr.mxu0 %v3214_v26  ;;  %2244 = vmatprep.subr.mxu1 %v3495_v62 }
 0x62e   :  { %1618 = vmatpush1.msra.mxu0 %v3218_v28  ;;  %2245 = vmatpush3.msra.mxu1 %v3312_v13 }
 0x62f   :  { %1619 = vmatprep.subr.mxu0 %v3222_v29  ;;  %2246 = vmatprep.subr.mxu1 %v3495_v62  ;;  %v3551_v29 = vld [vmem:[#allocation30_spill] sm:$0xff] }
 0x630   :  { %1620 = vmatpush1.msra.mxu0 %v3226_v30  ;;  %2247 = vmatpush3.msra.mxu1 %v3318_v17 }
 0x631   :  { %1621 = vmatprep.subr.mxu0 %v3230_v31  ;;  %2248 = vmatprep.subr.mxu1 %v3495_v62 }
 0x632   :  { %1622 = vmatpush1.msra.mxu0 %v3542_v54  ;;  %2249 = vmatpush3.msra.mxu1 %v3543_v55 }
 0x633   :  { %1623 = vmatprep.subr.mxu0 %v3544_v56  ;;  %2250 = vmatprep.subr.mxu1 %v3495_v62 }
 0x634   :  { %1624 = vmatpush1.msra.mxu0 %v3545_v57  ;;  %1657 = vmatprep.mubr.f32.mxu0 %v3495_v62 }
 0x635   :  { %2251 = vmatpush3.msra.mxu1 %v3546_v58  ;;  %2252 = vmatprep.mubr.msk.f32.mxu1 %vm2439_vm1, %v3495_v62 }
 0x6d5   :  { %v1489_v20 = vpop.f32.mrf.mxu0  ;;  %v1560_v47 = vpop.f32.mrf.mxu1 }
 0x6d6   :  { %v1490_v2 = vadd.f32 %v1489_v20, %v3547_v0  ;;  %v1561_v6 = vadd.f32 %v1560_v47, %v2851_v3 }
 0x6d7   :  { %v1491_v46 = vpop.f32.mrf.mxu0  ;;  %v2219_v4 = vpop.f32.mrf.mxu1 }
 0x6d8   :  { %v1564_v27 = vadd.f32 %v1490_v2, %v3548_v21  ;;  %v1492_v32 = vadd.f32 %v1491_v46, %v2836_v49 }
 0x6da   :  { %v1809_v61 = vmul.f32 -1.442695, %v1564_v27  ;;  %v1571_v10 = vadd.f32 %v1492_v32, %v3549_v45 }
 0x6dc   :  { %2323 = vpow2.f32 %v1809_v61  ;;  %v1810_v15 = vmul.f32 -1.442695, %v1571_v10 }
 0x6de   :  { %2325 = vpow2.f32 %v1810_v15 }
 0x6e9   :  { %v2324_v44 = vpop.eup %2323 }
 0x6ea   :  { %v1568_v5 = vadd.f32 1.0, %v2324_v44 }
 0x6eb   :  { %v2326_v62 = vpop.eup %2325 }
 0x6ec   :  { %2327 = vrcp.f32 %v1568_v5  ;;  %v1575_v63 = vadd.f32 1.0, %v2326_v62 }
 0x6ee   :  { %2329 = vrcp.f32 %v1575_v63 }
 0x6f9   :  { %v2328_v38 = vpop.eup %2327 }
 0x6fa   :  { %v1578_v60 = vmul.f32 %v2328_v38, %v1561_v6 }
 0x6fb   :  { %v2330_v9 = vpop.eup %2329 }
 0x6fc   :  { %v1579_v7 = vadd.f32 %v1578_v60, %v3550_v1  ;;  %v1581_v11 = vsub.f32 1.0, %v2330_v9  ;;  %v1583_v18 = vmul.f32 %v2330_v9, %v3345_v8 }
 0x6fe   :  { %2331 = vtanh.f32 %v1579_v7 }
 0x70b   :  { %v2332_v14 = vpop.eup %2331 }
 0x70c   :  { %v1582_v16 = vmul.f32 %v2332_v14, %v1581_v11 }
 0x70e   :  { %v1584_v19 = vadd.f32 %v1583_v18, %v1582_v16 }
 0x710   :  { %1586 = vst [vmem:[#allocation6 + $0x30] sm:$0xff] %v1584_v19  ;;  %1658 = vmatmul.mubr.f32.vlgmr.msra.gmra.mxu0 %v1584_v19  ;;  %2253 = vmatmul.mubr.f32.vlgmr.msra.gmra.mxu1 %v1584_v19 }
 0x7d0   :  { %v1659_v22 = vpop.f32.mrf.mxu0  ;;  %v1730_v23 = vpop.f32.mrf.mxu1 }
 0x7d1   :  { %v1660_v24 = vadd.f32 %v1659_v22, %v3547_v0  ;;  %v1731_v51 = vadd.f32 %v1730_v23, %v2851_v3 }
 0x7d2   :  { %v1661_v26 = vpop.f32.mrf.mxu0  ;;  %v2254_v28 = vpop.f32.mrf.mxu1 }
 0x7d3   :  { %v1734_v30 = vadd.f32 %v1660_v24, %v3551_v29  ;;  %v1662_v33 = vadd.f32 %v1661_v26, %v2836_v49 }
 0x7d5   :  { %v1811_v31 = vmul.f32 -1.442695, %v1734_v30  ;;  %v1741_v12 = vadd.f32 %v1662_v33, %v3552_v59 }
 0x7d7   :  { %2333 = vpow2.f32 %v1811_v31  ;;  %v1812_v13 = vmul.f32 -1.442695, %v1741_v12 }
 0x7d9   :  { %2335 = vpow2.f32 %v1812_v13 }
 0x7e4   :  { %v2334_v17 = vpop.eup %2333 }
 0x7e5   :  { %v1738_v53 = vadd.f32 1.0, %v2334_v17 }
 0x7e6   :  { %v2336_v34 = vpop.eup %2335 }
 0x7e7   :  { %2337 = vrcp.f32 %v1738_v53  ;;  %v1745_v50 = vadd.f32 1.0, %v2336_v34 }
 0x7e9   :  { %2339 = vrcp.f32 %v1745_v50 }
 0x7f4   :  { %v2338_v41 = vpop.eup %2337 }
 0x7f5   :  { %v1748_v42 = vmul.f32 %v2338_v41, %v1731_v51 }
 0x7f6   :  { %v2340_v37 = vpop.eup %2339 }
 0x7f7   :  { %v1749_v48 = vadd.f32 %v1748_v42, %v3553_v43  ;;  %v1751_v49 = vsub.f32 1.0, %v2340_v37  ;;  %v1753_v25 = vmul.f32 %v2340_v37, %v1584_v19 }
 0x7f9   :  { %2341 = vtanh.f32 %v1749_v48 }
 0x806   :  { %v2342_v52 = vpop.eup %2341 }
 0x807   :  { %v1752_v35 = vmul.f32 %v2342_v52, %v1751_v49 }
 0x809   :  { %v1754_v39 = vadd.f32 %v1753_v25, %v1752_v35 }
 0x80b   :  { %1756 = vst [vmem:[#allocation6 + $0x38] sm:$0xff] %v1754_v39 }
 0x80c   :  { %2422 = shalt.err (!%p2419_p9)
}
 0x80d   :  { %s2441_s30 = smov 128   ;;  %s2442_s6 = smov 8  }
 0x80e   :  { %1768 = dma.vmem_to_hbm [thread:$0]  %s1763_s28, 1024, %s3436_s5, [#allocation5], %s2441_s30, %s2441_s30, %s2442_s6  }
 0x80f   :  { %2433 = dma.done.wait [#allocation5], 1024  }
 0x810   :  { %2434 = vsyncadd [#allocation5], 4294966272 }
 0x811   :  { %1772 = vsyncpa [#allocation4], 1 }
 0x812   :  { %1773 = vsyncpa [#allocation5], 1 }

</bundles_post_ra>
